<compile_context>
chip_gen: v5e
topology: v5e:2x2
jax: 0.10.0
libtpu: 0.0.40
codegen_flags: <defaults>
</compile_context>

<pallas_src>
import functools
import math

import jax
import jax.numpy as jnp
from jax.experimental import pallas as pl
from jax.experimental.pallas import tpu as pltpu


# ------------------------------ fused Pallas kernel ------------------------------

def _fused_layer_kernel(xf_ref, xm_ref,
                        wqkv_ref, bqkv_ref, wo_ref, bo_ref,
                        norms_ref,
                        l1w_ref, l1b_ref, l2w_ref, l2b_ref,
                        l1mw_ref, l1mb_ref, l2mw_ref, l2mb_ref,
                        of_ref, om_ref,
                        *, nhead, eps):
    f32 = jnp.float32

    xf = xf_ref[0].astype(f32)            # (L, E)  frames, one batch element
    xm = xm_ref[0].astype(f32)            # (L, E)  motion, one batch element
    L, E = xf.shape
    Dh = E // nhead
    E2 = 2 * E
    scale = 1.0 / math.sqrt(Dh)

    W = wqkv_ref[...].astype(f32)         # (E, 3E)  [Wq | Wk | Wv] columns
    Bqkv = bqkv_ref[...].astype(f32)      # (1, 3E)
    Wo = wo_ref[...].astype(f32)          # (E, E)   out projection (in, out)
    Bo = bo_ref[...].astype(f32)          # (1, E)
    norms = norms_ref[...].astype(f32)    # (8, E)   [n1_g,n1_b,n2_g,n2_b,n1m_g,n1m_b,n2m_g,n2m_b]

    def layernorm(x, g, b):
        mu = jnp.mean(x, axis=-1, keepdims=True)
        var = jnp.mean(jnp.square(x - mu), axis=-1, keepdims=True)   # biased var (PyTorch LN)
        return (x - mu) * jax.lax.rsqrt(var + eps) * g + b

    def attend(q, k, v):
        # Multi-head attention core; head outputs are folded straight into the output
        # projection (sum_h o_h @ Wo[h*Dh:(h+1)*Dh, :]) so no concat / reshape is needed.
        out = jnp.zeros((L, E), f32)
        for h in range(nhead):                       # static unroll, nhead is small
            lo, hi = h * Dh, (h + 1) * Dh
            qh, kh, vh = q[:, lo:hi], k[:, lo:hi], v[:, lo:hi]
            s = jax.lax.dot_general(qh, kh, (((1,), (1,)), ((), ())),
                                    preferred_element_type=f32) * scale      # (L, L)
            s = s - jnp.max(s, axis=-1, keepdims=True)
            p = jnp.exp(s)
            p = p * pl.reciprocal(jnp.sum(p, axis=-1, keepdims=True), approx=True)
            oh = jnp.dot(p, vh, preferred_element_type=f32)                  # (L, Dh)
            out = out + jnp.dot(oh, Wo[lo:hi, :], preferred_element_type=f32)
        return out + Bo

    def ffn(x, w1_ref, b1_ref, w2_ref, b2_ref):
        h = jnp.dot(x, w1_ref[...].astype(f32), preferred_element_type=f32) + b1_ref[...].astype(f32)
        h = jnp.maximum(h, 0.0)                                             # ReLU; dropout = identity
        return jnp.dot(h, w2_ref[...].astype(f32), preferred_element_type=f32) + b2_ref[...].astype(f32)

    # ------------------------------ frames branch ------------------------------
    qkv_f = jnp.dot(xf, W, preferred_element_type=f32) + Bqkv               # fused QKV, one matmul
    attn_f = attend(qkv_f[:, :E], qkv_f[:, E:E2], qkv_f[:, E2:])
    xf2 = xf + attn_f                                # updated frames_embeddings (dropout1 identity)
    src = layernorm(xf2, norms[0:1], norms[1:2])
    # FFN input is the *pre-norm* residual xf2, exactly as in the reference forward.
    src2 = ffn(xf2, l1w_ref, l1b_ref, l2w_ref, l2b_ref)
    src_frames = layernorm(src + src2, norms[2:3], norms[3:4])

    # ------------------------------ motion branch ------------------------------
    # Q, K come from the UPDATED frames embeddings; V comes from the original motion
    # embeddings; same self_attn_frames weights (matches the reference forward exactly).
    qk_m = jnp.dot(xf2, W[:, :E2], preferred_element_type=f32) + Bqkv[:, :E2]   # (L, 2E)
    v_m = jnp.dot(xm, W[:, E2:], preferred_element_type=f32) + Bqkv[:, E2:]     # (L, E)
    attn_m = attend(qk_m[:, :E], qk_m[:, E:], v_m)
    xm2 = xm + attn_m                                                           # dropout1_m identity
    srcm = layernorm(xm2, norms[4:5], norms[5:6])
    src2m = ffn(xm2, l1mw_ref, l1mb_ref, l2mw_ref, l2mb_ref)
    src_motion = layernorm(srcm + src2m, norms[6:7], norms[7:8])

    of_ref[0] = src_frames.astype(of_ref.dtype)
    om_ref[0] = src_motion.astype(om_ref.dtype)


# ------------------------------ wrapper ------------------------------

def transformer_motion_encoder_layer(frames_embeddings, motion_embeddings, params, nhead):
    """frames_embeddings / motion_embeddings: (L, N, E) seq-first (PyTorch MHA default)."""
    L, N, E = frames_embeddings.shape
    dtype = frames_embeddings.dtype
    p = params

    # Batch-major layout so each grid step owns a full (L, E) slab (lane dim = E, full dims
    # satisfy TPU blocking rules).  These two tiny relayouts are the only XLA ops around the
    # single fused kernel.
    xf = jnp.transpose(frames_embeddings, (1, 0, 2))   # (N, L, E)
    xm = jnp.transpose(motion_embeddings, (1, 0, 2))   # (N, L, E)

    def batched(shape):
        return pl.BlockSpec((1,) + tuple(shape[1:]), lambda b: (b, 0, 0))

    def whole(shape):
        nd = len(shape)
        return pl.BlockSpec(tuple(shape), lambda b, _nd=nd: (0,) * _nd)

    args = (xf, xm,
            p["wqkv"], p["bqkv"], p["wo"], p["bo"], p["norms"],
            p["l1w"], p["l1b"], p["l2w"], p["l2b"],
            p["l1mw"], p["l1mb"], p["l2mw"], p["l2mb"])

    in_specs = [batched(xf.shape), batched(xm.shape)] + [whole(a.shape) for a in args[2:]]
    out_specs = (pl.BlockSpec((1, L, E), lambda b: (b, 0, 0)),
                 pl.BlockSpec((1, L, E), lambda b: (b, 0, 0)))
    out_shape = (jax.ShapeDtypeStruct((N, L, E), dtype),
                 jax.ShapeDtypeStruct((N, L, E), dtype))

    of, om = pl.pallas_call(
        functools.partial(_fused_layer_kernel, nhead=nhead, eps=1e-5),
        grid=(N,),
        in_specs=in_specs,
        out_specs=out_specs,
        out_shape=out_shape,
        compiler_params=pltpu.CompilerParams(dimension_semantics=("parallel",)),
    )(*args)

    return jnp.transpose(of, (1, 0, 2)), jnp.transpose(om, (1, 0, 2))


# ------------------------------ pure-JAX reference (for self-check) ------------------------------

def _reference_forward(frames, motion, params, nhead):
    E = frames.shape[-1]
    Dh = E // nhead
    eps = 1e-5
    p = params

    def ln(x, g, b):
        mu = jnp.mean(x, axis=-1, keepdims=True)
        var = jnp.mean(jnp.square(x - mu), axis=-1, keepdims=True)
        return (x - mu) * jax.lax.rsqrt(var + eps) * g + b

    def mha(x_qk, x_v):
        L, N, _ = x_qk.shape
        W = p["wqkv"]
        B = p["bqkv"][0]
        q = jnp.einsum('lne,ef->lnf', x_qk, W[:, :E]) + B[:E]
        k = jnp.einsum('lne,ef->lnf', x_qk, W[:, E:2 * E]) + B[E:2 * E]
        v = jnp.einsum('lne,ef->lnf', x_v, W[:, 2 * E:]) + B[2 * E:]
        q = q.reshape(L, N, nhead, Dh)
        k = k.reshape(L, N, nhead, Dh)
        v = v.reshape(L, N, nhead, Dh)
        s = jnp.einsum('qnhd,knhd->nhqk', q, k) / math.sqrt(Dh)
        prob = jax.nn.softmax(s, axis=-1)
        o = jnp.einsum('nhqk,knhd->qnhd', prob, v).reshape(L, N, E)
        return jnp.einsum('lne,ef->lnf', o, p["wo"]) + p["bo"][0]

    def ffn(x, w1, b1, w2, b2):
        h = jnp.maximum(jnp.einsum('lne,ef->lnf', x, w1) + b1[0], 0.0)
        return jnp.einsum('lnf,fe->lne', h, w2) + b2[0]

    fa = mha(frames, frames)
    frames2 = frames + fa
    src = ln(frames2, p["norms"][0], p["norms"][1])
    src2 = ffn(frames2, p["l1w"], p["l1b"], p["l2w"], p["l2b"])
    src_frames = ln(src + src2, p["norms"][2], p["norms"][3])

    ma = mha(frames2, motion)
    motion2 = motion + ma
    srcm = ln(motion2, p["norms"][4], p["norms"][5])
    src2m = ffn(motion2, p["l1mw"], p["l1mb"], p["l2mw"], p["l2mb"])
    src_motion = ln(srcm + src2m, p["norms"][6], p["norms"][7])
    return src_frames, src_motion


# ------------------------------ param init ------------------------------

def init_params(key, d_model, nhead, dim_feedforward):
    E, FF = d_model, dim_feedforward
    keys = jax.random.split(key, 16)

    def rnd(k, shape, scale=0.05):
        return (scale * jax.random.normal(k, shape)).astype(jnp.float32)

    in_proj_w = rnd(keys[0], (3 * E, E))          # PyTorch in_proj_weight layout (3E, E)
    in_proj_b = rnd(keys[1], (3 * E,))

    norms = jnp.concatenate([
        1.0 + rnd(keys[12], (1, E), 0.1), rnd(keys[13], (1, E), 0.1),   # norm1 g, b
        1.0 + rnd(keys[14], (1, E), 0.1), rnd(keys[15], (1, E), 0.1),   # norm2 g, b
        1.0 + rnd(keys[12], (1, E), 0.1), rnd(keys[13], (1, E), 0.1),   # norm1_m g, b
        1.0 + rnd(keys[14], (1, E), 0.1), rnd(keys[15], (1, E), 0.1),   # norm2_m g, b
    ], axis=0).astype(jnp.float32)

    return {
        "wqkv": jnp.asarray(in_proj_w.T),                         # (E, 3E)
        "bqkv": in_proj_b.reshape(1, 3 * E),
        "wo": rnd(keys[2], (E, E)).T,                             # (in, out)
        "bo": rnd(keys[3], (E,)).reshape(1, E),
        "l1w": rnd(keys[4], (FF, E)).T,  "l1b": rnd(keys[5], (FF,)).reshape(1, FF),
        "l2w": rnd(keys[6], (E, FF)).T,  "l2b": rnd(keys[7], (E,)).reshape(1, E),
        "l1mw": rnd(keys[8], (FF, E)).T, "l1mb": rnd(keys[9], (FF,)).reshape(1, FF),
        "l2mw": rnd(keys[10], (E, FF)).T, "l2mb": rnd(keys[11], (E,)).reshape(1, E),
        "norms": norms,
    }


# ------------------------------ main ------------------------------

if __name__ == "__main__":
    d_model = 32
    nhead = 4
    dim_feedforward = 64
    seq_len = 8
    batch = 2

    key = jax.random.PRNGKey(0)
    k_p, k_f, k_m = jax.random.split(key, 3)
    params = init_params(k_p, d_model, nhead, dim_feedforward)

    frames = jax.random.normal(k_f, (seq_len, batch, d_model), dtype=jnp.float32)
    motion = jax.random.normal(k_m, (seq_len, batch, d_model), dtype=jnp.float32)

    fwd = jax.jit(functools.partial(transformer_motion_encoder_layer, nhead=nhead))
    src_frames, src_motion = fwd(frames, motion, params)
    jax.block_until_ready((src_frames, src_motion))

    ref_frames, ref_motion = _reference_forward(frames, motion, params, nhead)

    assert src_frames.shape == (seq_len, batch, d_model)
    assert src_motion.shape == (seq_len, batch, d_model)
    assert jnp.all(jnp.isfinite(src_frames)) and jnp.all(jnp.isfinite(src_motion))
    assert jnp.allclose(src_frames, ref_frames, atol=5e-2, rtol=5e-2)
    assert jnp.allclose(src_motion, ref_motion, atol=5e-2, rtol=5e-2)
    print("KERNEL_OK")
</pallas_src>

<mosaic_0001>
module attributes {stable_mosaic.version = 11 : i64} {
  func.func @_fused_layer_kernel(%arg0: i32, %arg1: memref<1x8x32xf32, #tpu.memory_space<vmem>>, %arg2: memref<1x8x32xf32, #tpu.memory_space<vmem>>, %arg3: memref<32x96xf32, #tpu.memory_space<vmem>>, %arg4: memref<1x96xf32, #tpu.memory_space<vmem>>, %arg5: memref<32x32xf32, #tpu.memory_space<vmem>>, %arg6: memref<1x32xf32, #tpu.memory_space<vmem>>, %arg7: memref<8x32xf32, #tpu.memory_space<vmem>>, %arg8: memref<32x64xf32, #tpu.memory_space<vmem>>, %arg9: memref<1x64xf32, #tpu.memory_space<vmem>>, %arg10: memref<64x32xf32, #tpu.memory_space<vmem>>, %arg11: memref<1x32xf32, #tpu.memory_space<vmem>>, %arg12: memref<32x64xf32, #tpu.memory_space<vmem>>, %arg13: memref<1x64xf32, #tpu.memory_space<vmem>>, %arg14: memref<64x32xf32, #tpu.memory_space<vmem>>, %arg15: memref<1x32xf32, #tpu.memory_space<vmem>>, %arg16: memref<1x8x32xf32, #tpu.memory_space<vmem>>, %arg17: memref<1x8x32xf32, #tpu.memory_space<vmem>>) attributes {dimension_semantics = [#tpu.dimension_semantics<parallel>], iteration_bounds = array<i64: 2>, scalar_prefetch = 0 : i64, scratch_operands = 0 : i64, tpu.core_type = #tpu.core_type<tc>, window_params = [{transform_indices = @transform_0, window_bounds = array<i64: 1, 8, 32>}, {transform_indices = @transform_1, window_bounds = array<i64: 1, 8, 32>}, {pipeline_mode = #tpu.pipeline_mode<synchronous>, transform_indices = @transform_2, window_bounds = array<i64: 32, 96>}, {pipeline_mode = #tpu.pipeline_mode<synchronous>, transform_indices = @transform_3, window_bounds = array<i64: 1, 96>}, {pipeline_mode = #tpu.pipeline_mode<synchronous>, transform_indices = @transform_4, window_bounds = array<i64: 32, 32>}, {pipeline_mode = #tpu.pipeline_mode<synchronous>, transform_indices = @transform_5, window_bounds = array<i64: 1, 32>}, {pipeline_mode = #tpu.pipeline_mode<synchronous>, transform_indices = @transform_6, window_bounds = array<i64: 8, 32>}, {pipeline_mode = #tpu.pipeline_mode<synchronous>, transform_indices = @transform_7, window_bounds = array<i64: 32, 64>}, {pipeline_mode = #tpu.pipeline_mode<synchronous>, transform_indices = @transform_8, window_bounds = array<i64: 1, 64>}, {pipeline_mode = #tpu.pipeline_mode<synchronous>, transform_indices = @transform_9, window_bounds = array<i64: 64, 32>}, {pipeline_mode = #tpu.pipeline_mode<synchronous>, transform_indices = @transform_10, window_bounds = array<i64: 1, 32>}, {pipeline_mode = #tpu.pipeline_mode<synchronous>, transform_indices = @transform_11, window_bounds = array<i64: 32, 64>}, {pipeline_mode = #tpu.pipeline_mode<synchronous>, transform_indices = @transform_12, window_bounds = array<i64: 1, 64>}, {pipeline_mode = #tpu.pipeline_mode<synchronous>, transform_indices = @transform_13, window_bounds = array<i64: 64, 32>}, {pipeline_mode = #tpu.pipeline_mode<synchronous>, transform_indices = @transform_14, window_bounds = array<i64: 1, 32>}, {transform_indices = @transform_15, window_bounds = array<i64: 1, 8, 32>}, {transform_indices = @transform_16, window_bounds = array<i64: 1, 8, 32>}]} {
    %c0 = arith.constant 0 : index
    %c0_0 = arith.constant 0 : index
    %c0_1 = arith.constant 0 : index
    %0 = vector.load %arg1[%c0, %c0_0, %c0_1] : memref<1x8x32xf32, #tpu.memory_space<vmem>>, vector<1x8x32xf32>
    %1 = vector.shape_cast %0 : vector<1x8x32xf32> to vector<8x32xf32>
    %c0_2 = arith.constant 0 : index
    %c0_3 = arith.constant 0 : index
    %c0_4 = arith.constant 0 : index
    %2 = vector.load %arg2[%c0_2, %c0_3, %c0_4] : memref<1x8x32xf32, #tpu.memory_space<vmem>>, vector<1x8x32xf32>
    %3 = vector.shape_cast %2 : vector<1x8x32xf32> to vector<8x32xf32>
    %c0_5 = arith.constant 0 : index
    %c0_6 = arith.constant 0 : index
    %4 = vector.load %arg3[%c0_5, %c0_6] : memref<32x96xf32, #tpu.memory_space<vmem>>, vector<32x96xf32>
    %c0_7 = arith.constant 0 : index
    %c0_8 = arith.constant 0 : index
    %5 = vector.load %arg4[%c0_7, %c0_8] : memref<1x96xf32, #tpu.memory_space<vmem>>, vector<1x96xf32>
    %c0_9 = arith.constant 0 : index
    %c0_10 = arith.constant 0 : index
    %6 = vector.load %arg5[%c0_9, %c0_10] : memref<32x32xf32, #tpu.memory_space<vmem>>, vector<32x32xf32>
    %c0_11 = arith.constant 0 : index
    %c0_12 = arith.constant 0 : index
    %7 = vector.load %arg6[%c0_11, %c0_12] : memref<1x32xf32, #tpu.memory_space<vmem>>, vector<1x32xf32>
    %c0_13 = arith.constant 0 : index
    %c0_14 = arith.constant 0 : index
    %8 = vector.load %arg7[%c0_13, %c0_14] : memref<8x32xf32, #tpu.memory_space<vmem>>, vector<8x32xf32>
    %cst = arith.constant dense<0.000000e+00> : vector<8x96xf32>
    %9 = tpu.matmul %1, %4, %cst {dimension_numbers = #tpu.dot_dimension_numbers<[1], [0], [0], [1], [0, 0, 1, 1], [], []>} : vector<8x32xf32>, vector<32x96xf32>, vector<8x96xf32> -> vector<8x96xf32>
    %10 = vector.broadcast %5 : vector<1x96xf32> to vector<8x96xf32>
    %11 = arith.addf %9, %10 : vector<8x96xf32>
    %12 = vector.extract_strided_slice %11 {offsets = [0, 0], sizes = [8, 32], strides = [1, 1]} : vector<8x96xf32> to vector<8x32xf32>
    %13 = vector.extract_strided_slice %11 {offsets = [0, 32], sizes = [8, 32], strides = [1, 1]} : vector<8x96xf32> to vector<8x32xf32>
    %14 = vector.extract_strided_slice %11 {offsets = [0, 64], sizes = [8, 32], strides = [1, 1]} : vector<8x96xf32> to vector<8x32xf32>
    %cst_15 = arith.constant 0.000000e+00 : f32
    %15 = vector.broadcast %cst_15 : f32 to vector<8x32xf32>
    %16 = vector.extract_strided_slice %12 {offsets = [0, 0], sizes = [8, 8], strides = [1, 1]} : vector<8x32xf32> to vector<8x8xf32>
    %17 = vector.extract_strided_slice %13 {offsets = [0, 0], sizes = [8, 8], strides = [1, 1]} : vector<8x32xf32> to vector<8x8xf32>
    %18 = vector.extract_strided_slice %14 {offsets = [0, 0], sizes = [8, 8], strides = [1, 1]} : vector<8x32xf32> to vector<8x8xf32>
    %cst_16 = arith.constant dense<0.000000e+00> : vector<8x8xf32>
    %19 = tpu.matmul %16, %17, %cst_16 {dimension_numbers = #tpu.dot_dimension_numbers<[1], [1], [0], [0], [0, 0, 1, 0], [], []>} : vector<8x8xf32>, vector<8x8xf32>, vector<8x8xf32> -> vector<8x8xf32>
    %cst_17 = arith.constant 0.353553385 : f32
    %20 = vector.broadcast %cst_17 : f32 to vector<8x8xf32>
    %21 = arith.mulf %19, %20 : vector<8x8xf32>
    %cst_18 = arith.constant dense<0xFF800000> : vector<8xf32>
    %22 = vector.multi_reduction <maximumf>, %21, %cst_18 [1] : vector<8x8xf32> to vector<8xf32>
    %23 = vector.shape_cast %22 : vector<8xf32> to vector<8x1xf32>
    %24 = vector.broadcast %23 : vector<8x1xf32> to vector<8x8xf32>
    %25 = arith.subf %21, %24 : vector<8x8xf32>
    %26 = math.exp %25 : vector<8x8xf32>
    %cst_19 = arith.constant dense<0.000000e+00> : vector<8xf32>
    %27 = vector.multi_reduction <add>, %26, %cst_19 [1] : vector<8x8xf32> to vector<8xf32>
    %28 = vector.shape_cast %27 : vector<8xf32> to vector<8x1xf32>
    %29 = tpu.reciprocal %28 {approx = true} : vector<8x1xf32> -> vector<8x1xf32>
    %30 = vector.broadcast %29 : vector<8x1xf32> to vector<8x8xf32>
    %31 = arith.mulf %26, %30 : vector<8x8xf32>
    %cst_20 = arith.constant dense<0.000000e+00> : vector<8x8xf32>
    %32 = tpu.matmul %31, %18, %cst_20 {dimension_numbers = #tpu.dot_dimension_numbers<[1], [0], [0], [1], [0, 0, 1, 1], [], []>} : vector<8x8xf32>, vector<8x8xf32>, vector<8x8xf32> -> vector<8x8xf32>
    %33 = vector.extract_strided_slice %6 {offsets = [0, 0], sizes = [8, 32], strides = [1, 1]} : vector<32x32xf32> to vector<8x32xf32>
    %cst_21 = arith.constant dense<0.000000e+00> : vector<8x32xf32>
    %34 = tpu.matmul %32, %33, %cst_21 {dimension_numbers = #tpu.dot_dimension_numbers<[1], [0], [0], [1], [0, 0, 1, 1], [], []>} : vector<8x8xf32>, vector<8x32xf32>, vector<8x32xf32> -> vector<8x32xf32>
    %35 = arith.addf %15, %34 : vector<8x32xf32>
    %36 = vector.extract_strided_slice %12 {offsets = [0, 8], sizes = [8, 8], strides = [1, 1]} : vector<8x32xf32> to vector<8x8xf32>
    %37 = vector.extract_strided_slice %13 {offsets = [0, 8], sizes = [8, 8], strides = [1, 1]} : vector<8x32xf32> to vector<8x8xf32>
    %38 = vector.extract_strided_slice %14 {offsets = [0, 8], sizes = [8, 8], strides = [1, 1]} : vector<8x32xf32> to vector<8x8xf32>
    %cst_22 = arith.constant dense<0.000000e+00> : vector<8x8xf32>
    %39 = tpu.matmul %36, %37, %cst_22 {dimension_numbers = #tpu.dot_dimension_numbers<[1], [1], [0], [0], [0, 0, 1, 0], [], []>} : vector<8x8xf32>, vector<8x8xf32>, vector<8x8xf32> -> vector<8x8xf32>
    %cst_23 = arith.constant 0.353553385 : f32
    %40 = vector.broadcast %cst_23 : f32 to vector<8x8xf32>
    %41 = arith.mulf %39, %40 : vector<8x8xf32>
    %cst_24 = arith.constant dense<0xFF800000> : vector<8xf32>
    %42 = vector.multi_reduction <maximumf>, %41, %cst_24 [1] : vector<8x8xf32> to vector<8xf32>
    %43 = vector.shape_cast %42 : vector<8xf32> to vector<8x1xf32>
    %44 = vector.broadcast %43 : vector<8x1xf32> to vector<8x8xf32>
    %45 = arith.subf %41, %44 : vector<8x8xf32>
    %46 = math.exp %45 : vector<8x8xf32>
    %cst_25 = arith.constant dense<0.000000e+00> : vector<8xf32>
    %47 = vector.multi_reduction <add>, %46, %cst_25 [1] : vector<8x8xf32> to vector<8xf32>
    %48 = vector.shape_cast %47 : vector<8xf32> to vector<8x1xf32>
    %49 = tpu.reciprocal %48 {approx = true} : vector<8x1xf32> -> vector<8x1xf32>
    %50 = vector.broadcast %49 : vector<8x1xf32> to vector<8x8xf32>
    %51 = arith.mulf %46, %50 : vector<8x8xf32>
    %cst_26 = arith.constant dense<0.000000e+00> : vector<8x8xf32>
    %52 = tpu.matmul %51, %38, %cst_26 {dimension_numbers = #tpu.dot_dimension_numbers<[1], [0], [0], [1], [0, 0, 1, 1], [], []>} : vector<8x8xf32>, vector<8x8xf32>, vector<8x8xf32> -> vector<8x8xf32>
    %53 = vector.extract_strided_slice %6 {offsets = [8, 0], sizes = [8, 32], strides = [1, 1]} : vector<32x32xf32> to vector<8x32xf32>
    %cst_27 = arith.constant dense<0.000000e+00> : vector<8x32xf32>
    %54 = tpu.matmul %52, %53, %cst_27 {dimension_numbers = #tpu.dot_dimension_numbers<[1], [0], [0], [1], [0, 0, 1, 1], [], []>} : vector<8x8xf32>, vector<8x32xf32>, vector<8x32xf32> -> vector<8x32xf32>
    %55 = arith.addf %35, %54 : vector<8x32xf32>
    %56 = vector.extract_strided_slice %12 {offsets = [0, 16], sizes = [8, 8], strides = [1, 1]} : vector<8x32xf32> to vector<8x8xf32>
    %57 = vector.extract_strided_slice %13 {offsets = [0, 16], sizes = [8, 8], strides = [1, 1]} : vector<8x32xf32> to vector<8x8xf32>
    %58 = vector.extract_strided_slice %14 {offsets = [0, 16], sizes = [8, 8], strides = [1, 1]} : vector<8x32xf32> to vector<8x8xf32>
    %cst_28 = arith.constant dense<0.000000e+00> : vector<8x8xf32>
    %59 = tpu.matmul %56, %57, %cst_28 {dimension_numbers = #tpu.dot_dimension_numbers<[1], [1], [0], [0], [0, 0, 1, 0], [], []>} : vector<8x8xf32>, vector<8x8xf32>, vector<8x8xf32> -> vector<8x8xf32>
    %cst_29 = arith.constant 0.353553385 : f32
    %60 = vector.broadcast %cst_29 : f32 to vector<8x8xf32>
    %61 = arith.mulf %59, %60 : vector<8x8xf32>
    %cst_30 = arith.constant dense<0xFF800000> : vector<8xf32>
    %62 = vector.multi_reduction <maximumf>, %61, %cst_30 [1] : vector<8x8xf32> to vector<8xf32>
    %63 = vector.shape_cast %62 : vector<8xf32> to vector<8x1xf32>
    %64 = vector.broadcast %63 : vector<8x1xf32> to vector<8x8xf32>
    %65 = arith.subf %61, %64 : vector<8x8xf32>
    %66 = math.exp %65 : vector<8x8xf32>
    %cst_31 = arith.constant dense<0.000000e+00> : vector<8xf32>
    %67 = vector.multi_reduction <add>, %66, %cst_31 [1] : vector<8x8xf32> to vector<8xf32>
    %68 = vector.shape_cast %67 : vector<8xf32> to vector<8x1xf32>
    %69 = tpu.reciprocal %68 {approx = true} : vector<8x1xf32> -> vector<8x1xf32>
    %70 = vector.broadcast %69 : vector<8x1xf32> to vector<8x8xf32>
    %71 = arith.mulf %66, %70 : vector<8x8xf32>
    %cst_32 = arith.constant dense<0.000000e+00> : vector<8x8xf32>
    %72 = tpu.matmul %71, %58, %cst_32 {dimension_numbers = #tpu.dot_dimension_numbers<[1], [0], [0], [1], [0, 0, 1, 1], [], []>} : vector<8x8xf32>, vector<8x8xf32>, vector<8x8xf32> -> vector<8x8xf32>
    %73 = vector.extract_strided_slice %6 {offsets = [16, 0], sizes = [8, 32], strides = [1, 1]} : vector<32x32xf32> to vector<8x32xf32>
    %cst_33 = arith.constant dense<0.000000e+00> : vector<8x32xf32>
    %74 = tpu.matmul %72, %73, %cst_33 {dimension_numbers = #tpu.dot_dimension_numbers<[1], [0], [0], [1], [0, 0, 1, 1], [], []>} : vector<8x8xf32>, vector<8x32xf32>, vector<8x32xf32> -> vector<8x32xf32>
    %75 = arith.addf %55, %74 : vector<8x32xf32>
    %76 = vector.extract_strided_slice %12 {offsets = [0, 24], sizes = [8, 8], strides = [1, 1]} : vector<8x32xf32> to vector<8x8xf32>
    %77 = vector.extract_strided_slice %13 {offsets = [0, 24], sizes = [8, 8], strides = [1, 1]} : vector<8x32xf32> to vector<8x8xf32>
    %78 = vector.extract_strided_slice %14 {offsets = [0, 24], sizes = [8, 8], strides = [1, 1]} : vector<8x32xf32> to vector<8x8xf32>
    %cst_34 = arith.constant dense<0.000000e+00> : vector<8x8xf32>
    %79 = tpu.matmul %76, %77, %cst_34 {dimension_numbers = #tpu.dot_dimension_numbers<[1], [1], [0], [0], [0, 0, 1, 0], [], []>} : vector<8x8xf32>, vector<8x8xf32>, vector<8x8xf32> -> vector<8x8xf32>
    %cst_35 = arith.constant 0.353553385 : f32
    %80 = vector.broadcast %cst_35 : f32 to vector<8x8xf32>
    %81 = arith.mulf %79, %80 : vector<8x8xf32>
    %cst_36 = arith.constant dense<0xFF800000> : vector<8xf32>
    %82 = vector.multi_reduction <maximumf>, %81, %cst_36 [1] : vector<8x8xf32> to vector<8xf32>
    %83 = vector.shape_cast %82 : vector<8xf32> to vector<8x1xf32>
    %84 = vector.broadcast %83 : vector<8x1xf32> to vector<8x8xf32>
    %85 = arith.subf %81, %84 : vector<8x8xf32>
    %86 = math.exp %85 : vector<8x8xf32>
    %cst_37 = arith.constant dense<0.000000e+00> : vector<8xf32>
    %87 = vector.multi_reduction <add>, %86, %cst_37 [1] : vector<8x8xf32> to vector<8xf32>
    %88 = vector.shape_cast %87 : vector<8xf32> to vector<8x1xf32>
    %89 = tpu.reciprocal %88 {approx = true} : vector<8x1xf32> -> vector<8x1xf32>
    %90 = vector.broadcast %89 : vector<8x1xf32> to vector<8x8xf32>
    %91 = arith.mulf %86, %90 : vector<8x8xf32>
    %cst_38 = arith.constant dense<0.000000e+00> : vector<8x8xf32>
    %92 = tpu.matmul %91, %78, %cst_38 {dimension_numbers = #tpu.dot_dimension_numbers<[1], [0], [0], [1], [0, 0, 1, 1], [], []>} : vector<8x8xf32>, vector<8x8xf32>, vector<8x8xf32> -> vector<8x8xf32>
    %93 = vector.extract_strided_slice %6 {offsets = [24, 0], sizes = [8, 32], strides = [1, 1]} : vector<32x32xf32> to vector<8x32xf32>
    %cst_39 = arith.constant dense<0.000000e+00> : vector<8x32xf32>
    %94 = tpu.matmul %92, %93, %cst_39 {dimension_numbers = #tpu.dot_dimension_numbers<[1], [0], [0], [1], [0, 0, 1, 1], [], []>} : vector<8x8xf32>, vector<8x32xf32>, vector<8x32xf32> -> vector<8x32xf32>
    %95 = arith.addf %75, %94 : vector<8x32xf32>
    %96 = vector.broadcast %7 : vector<1x32xf32> to vector<8x32xf32>
    %97 = arith.addf %95, %96 : vector<8x32xf32>
    %98 = arith.addf %1, %97 : vector<8x32xf32>
    %99 = vector.extract_strided_slice %8 {offsets = [0, 0], sizes = [1, 32], strides = [1, 1]} : vector<8x32xf32> to vector<1x32xf32>
    %100 = vector.extract_strided_slice %8 {offsets = [1, 0], sizes = [1, 32], strides = [1, 1]} : vector<8x32xf32> to vector<1x32xf32>
    %cst_40 = arith.constant dense<0.000000e+00> : vector<8xf32>
    %101 = vector.multi_reduction <add>, %98, %cst_40 [1] : vector<8x32xf32> to vector<8xf32>
    %102 = vector.shape_cast %101 : vector<8xf32> to vector<8x1xf32>
    %cst_41 = arith.constant 3.200000e+01 : f32
    %103 = vector.broadcast %cst_41 : f32 to vector<8x1xf32>
    %104 = arith.divf %102, %103 : vector<8x1xf32>
    %105 = vector.broadcast %104 : vector<8x1xf32> to vector<8x32xf32>
    %106 = arith.subf %98, %105 : vector<8x32xf32>
    %107 = arith.mulf %106, %106 : vector<8x32xf32>
    %cst_42 = arith.constant dense<0.000000e+00> : vector<8xf32>
    %108 = vector.multi_reduction <add>, %107, %cst_42 [1] : vector<8x32xf32> to vector<8xf32>
    %109 = vector.shape_cast %108 : vector<8xf32> to vector<8x1xf32>
    %cst_43 = arith.constant 3.200000e+01 : f32
    %110 = vector.broadcast %cst_43 : f32 to vector<8x1xf32>
    %111 = arith.divf %109, %110 : vector<8x1xf32>
    %112 = vector.broadcast %104 : vector<8x1xf32> to vector<8x32xf32>
    %113 = arith.subf %98, %112 : vector<8x32xf32>
    %cst_44 = arith.constant 9.99999974E-6 : f32
    %114 = vector.broadcast %cst_44 : f32 to vector<8x1xf32>
    %115 = arith.addf %111, %114 : vector<8x1xf32>
    %116 = math.rsqrt %115 : vector<8x1xf32>
    %117 = vector.broadcast %116 : vector<8x1xf32> to vector<8x32xf32>
    %118 = arith.mulf %113, %117 : vector<8x32xf32>
    %119 = vector.broadcast %99 : vector<1x32xf32> to vector<8x32xf32>
    %120 = arith.mulf %118, %119 : vector<8x32xf32>
    %121 = vector.broadcast %100 : vector<1x32xf32> to vector<8x32xf32>
    %122 = arith.addf %120, %121 : vector<8x32xf32>
    %c0_45 = arith.constant 0 : index
    %c0_46 = arith.constant 0 : index
    %123 = vector.load %arg8[%c0_45, %c0_46] : memref<32x64xf32, #tpu.memory_space<vmem>>, vector<32x64xf32>
    %cst_47 = arith.constant dense<0.000000e+00> : vector<8x64xf32>
    %124 = tpu.matmul %98, %123, %cst_47 {dimension_numbers = #tpu.dot_dimension_numbers<[1], [0], [0], [1], [0, 0, 1, 1], [], []>} : vector<8x32xf32>, vector<32x64xf32>, vector<8x64xf32> -> vector<8x64xf32>
    %c0_48 = arith.constant 0 : index
    %c0_49 = arith.constant 0 : index
    %125 = vector.load %arg9[%c0_48, %c0_49] : memref<1x64xf32, #tpu.memory_space<vmem>>, vector<1x64xf32>
    %126 = vector.broadcast %125 : vector<1x64xf32> to vector<8x64xf32>
    %127 = arith.addf %124, %126 : vector<8x64xf32>
    %cst_50 = arith.constant 0.000000e+00 : f32
    %128 = vector.broadcast %cst_50 : f32 to vector<8x64xf32>
    %129 = arith.maximumf %127, %128 : vector<8x64xf32>
    %c0_51 = arith.constant 0 : index
    %c0_52 = arith.constant 0 : index
    %130 = vector.load %arg10[%c0_51, %c0_52] : memref<64x32xf32, #tpu.memory_space<vmem>>, vector<64x32xf32>
    %cst_53 = arith.constant dense<0.000000e+00> : vector<8x32xf32>
    %131 = tpu.matmul %129, %130, %cst_53 {dimension_numbers = #tpu.dot_dimension_numbers<[1], [0], [0], [1], [0, 0, 1, 1], [], []>} : vector<8x64xf32>, vector<64x32xf32>, vector<8x32xf32> -> vector<8x32xf32>
    %c0_54 = arith.constant 0 : index
    %c0_55 = arith.constant 0 : index
    %132 = vector.load %arg11[%c0_54, %c0_55] : memref<1x32xf32, #tpu.memory_space<vmem>>, vector<1x32xf32>
    %133 = vector.broadcast %132 : vector<1x32xf32> to vector<8x32xf32>
    %134 = arith.addf %131, %133 : vector<8x32xf32>
    %135 = arith.addf %122, %134 : vector<8x32xf32>
    %136 = vector.extract_strided_slice %8 {offsets = [2, 0], sizes = [1, 32], strides = [1, 1]} : vector<8x32xf32> to vector<1x32xf32>
    %137 = vector.extract_strided_slice %8 {offsets = [3, 0], sizes = [1, 32], strides = [1, 1]} : vector<8x32xf32> to vector<1x32xf32>
    %cst_56 = arith.constant dense<0.000000e+00> : vector<8xf32>
    %138 = vector.multi_reduction <add>, %135, %cst_56 [1] : vector<8x32xf32> to vector<8xf32>
    %139 = vector.shape_cast %138 : vector<8xf32> to vector<8x1xf32>
    %cst_57 = arith.constant 3.200000e+01 : f32
    %140 = vector.broadcast %cst_57 : f32 to vector<8x1xf32>
    %141 = arith.divf %139, %140 : vector<8x1xf32>
    %142 = vector.broadcast %141 : vector<8x1xf32> to vector<8x32xf32>
    %143 = arith.subf %135, %142 : vector<8x32xf32>
    %144 = arith.mulf %143, %143 : vector<8x32xf32>
    %cst_58 = arith.constant dense<0.000000e+00> : vector<8xf32>
    %145 = vector.multi_reduction <add>, %144, %cst_58 [1] : vector<8x32xf32> to vector<8xf32>
    %146 = vector.shape_cast %145 : vector<8xf32> to vector<8x1xf32>
    %cst_59 = arith.constant 3.200000e+01 : f32
    %147 = vector.broadcast %cst_59 : f32 to vector<8x1xf32>
    %148 = arith.divf %146, %147 : vector<8x1xf32>
    %149 = vector.broadcast %141 : vector<8x1xf32> to vector<8x32xf32>
    %150 = arith.subf %135, %149 : vector<8x32xf32>
    %cst_60 = arith.constant 9.99999974E-6 : f32
    %151 = vector.broadcast %cst_60 : f32 to vector<8x1xf32>
    %152 = arith.addf %148, %151 : vector<8x1xf32>
    %153 = math.rsqrt %152 : vector<8x1xf32>
    %154 = vector.broadcast %153 : vector<8x1xf32> to vector<8x32xf32>
    %155 = arith.mulf %150, %154 : vector<8x32xf32>
    %156 = vector.broadcast %136 : vector<1x32xf32> to vector<8x32xf32>
    %157 = arith.mulf %155, %156 : vector<8x32xf32>
    %158 = vector.broadcast %137 : vector<1x32xf32> to vector<8x32xf32>
    %159 = arith.addf %157, %158 : vector<8x32xf32>
    %160 = vector.extract_strided_slice %4 {offsets = [0, 0], sizes = [32, 64], strides = [1, 1]} : vector<32x96xf32> to vector<32x64xf32>
    %cst_61 = arith.constant dense<0.000000e+00> : vector<8x64xf32>
    %161 = tpu.matmul %98, %160, %cst_61 {dimension_numbers = #tpu.dot_dimension_numbers<[1], [0], [0], [1], [0, 0, 1, 1], [], []>} : vector<8x32xf32>, vector<32x64xf32>, vector<8x64xf32> -> vector<8x64xf32>
    %162 = vector.extract_strided_slice %5 {offsets = [0, 0], sizes = [1, 64], strides = [1, 1]} : vector<1x96xf32> to vector<1x64xf32>
    %163 = vector.broadcast %162 : vector<1x64xf32> to vector<8x64xf32>
    %164 = arith.addf %161, %163 : vector<8x64xf32>
    %165 = vector.extract_strided_slice %4 {offsets = [0, 64], sizes = [32, 32], strides = [1, 1]} : vector<32x96xf32> to vector<32x32xf32>
    %cst_62 = arith.constant dense<0.000000e+00> : vector<8x32xf32>
    %166 = tpu.matmul %3, %165, %cst_62 {dimension_numbers = #tpu.dot_dimension_numbers<[1], [0], [0], [1], [0, 0, 1, 1], [], []>} : vector<8x32xf32>, vector<32x32xf32>, vector<8x32xf32> -> vector<8x32xf32>
    %167 = vector.extract_strided_slice %5 {offsets = [0, 64], sizes = [1, 32], strides = [1, 1]} : vector<1x96xf32> to vector<1x32xf32>
    %168 = vector.broadcast %167 : vector<1x32xf32> to vector<8x32xf32>
    %169 = arith.addf %166, %168 : vector<8x32xf32>
    %170 = vector.extract_strided_slice %164 {offsets = [0, 0], sizes = [8, 32], strides = [1, 1]} : vector<8x64xf32> to vector<8x32xf32>
    %171 = vector.extract_strided_slice %164 {offsets = [0, 32], sizes = [8, 32], strides = [1, 1]} : vector<8x64xf32> to vector<8x32xf32>
    %cst_63 = arith.constant 0.000000e+00 : f32
    %172 = vector.broadcast %cst_63 : f32 to vector<8x32xf32>
    %173 = vector.extract_strided_slice %170 {offsets = [0, 0], sizes = [8, 8], strides = [1, 1]} : vector<8x32xf32> to vector<8x8xf32>
    %174 = vector.extract_strided_slice %171 {offsets = [0, 0], sizes = [8, 8], strides = [1, 1]} : vector<8x32xf32> to vector<8x8xf32>
    %175 = vector.extract_strided_slice %169 {offsets = [0, 0], sizes = [8, 8], strides = [1, 1]} : vector<8x32xf32> to vector<8x8xf32>
    %cst_64 = arith.constant dense<0.000000e+00> : vector<8x8xf32>
    %176 = tpu.matmul %173, %174, %cst_64 {dimension_numbers = #tpu.dot_dimension_numbers<[1], [1], [0], [0], [0, 0, 1, 0], [], []>} : vector<8x8xf32>, vector<8x8xf32>, vector<8x8xf32> -> vector<8x8xf32>
    %cst_65 = arith.constant 0.353553385 : f32
    %177 = vector.broadcast %cst_65 : f32 to vector<8x8xf32>
    %178 = arith.mulf %176, %177 : vector<8x8xf32>
    %cst_66 = arith.constant dense<0xFF800000> : vector<8xf32>
    %179 = vector.multi_reduction <maximumf>, %178, %cst_66 [1] : vector<8x8xf32> to vector<8xf32>
    %180 = vector.shape_cast %179 : vector<8xf32> to vector<8x1xf32>
    %181 = vector.broadcast %180 : vector<8x1xf32> to vector<8x8xf32>
    %182 = arith.subf %178, %181 : vector<8x8xf32>
    %183 = math.exp %182 : vector<8x8xf32>
    %cst_67 = arith.constant dense<0.000000e+00> : vector<8xf32>
    %184 = vector.multi_reduction <add>, %183, %cst_67 [1] : vector<8x8xf32> to vector<8xf32>
    %185 = vector.shape_cast %184 : vector<8xf32> to vector<8x1xf32>
    %186 = tpu.reciprocal %185 {approx = true} : vector<8x1xf32> -> vector<8x1xf32>
    %187 = vector.broadcast %186 : vector<8x1xf32> to vector<8x8xf32>
    %188 = arith.mulf %183, %187 : vector<8x8xf32>
    %cst_68 = arith.constant dense<0.000000e+00> : vector<8x8xf32>
    %189 = tpu.matmul %188, %175, %cst_68 {dimension_numbers = #tpu.dot_dimension_numbers<[1], [0], [0], [1], [0, 0, 1, 1], [], []>} : vector<8x8xf32>, vector<8x8xf32>, vector<8x8xf32> -> vector<8x8xf32>
    %190 = vector.extract_strided_slice %6 {offsets = [0, 0], sizes = [8, 32], strides = [1, 1]} : vector<32x32xf32> to vector<8x32xf32>
    %cst_69 = arith.constant dense<0.000000e+00> : vector<8x32xf32>
    %191 = tpu.matmul %189, %190, %cst_69 {dimension_numbers = #tpu.dot_dimension_numbers<[1], [0], [0], [1], [0, 0, 1, 1], [], []>} : vector<8x8xf32>, vector<8x32xf32>, vector<8x32xf32> -> vector<8x32xf32>
    %192 = arith.addf %172, %191 : vector<8x32xf32>
    %193 = vector.extract_strided_slice %170 {offsets = [0, 8], sizes = [8, 8], strides = [1, 1]} : vector<8x32xf32> to vector<8x8xf32>
    %194 = vector.extract_strided_slice %171 {offsets = [0, 8], sizes = [8, 8], strides = [1, 1]} : vector<8x32xf32> to vector<8x8xf32>
    %195 = vector.extract_strided_slice %169 {offsets = [0, 8], sizes = [8, 8], strides = [1, 1]} : vector<8x32xf32> to vector<8x8xf32>
    %cst_70 = arith.constant dense<0.000000e+00> : vector<8x8xf32>
    %196 = tpu.matmul %193, %194, %cst_70 {dimension_numbers = #tpu.dot_dimension_numbers<[1], [1], [0], [0], [0, 0, 1, 0], [], []>} : vector<8x8xf32>, vector<8x8xf32>, vector<8x8xf32> -> vector<8x8xf32>
    %cst_71 = arith.constant 0.353553385 : f32
    %197 = vector.broadcast %cst_71 : f32 to vector<8x8xf32>
    %198 = arith.mulf %196, %197 : vector<8x8xf32>
    %cst_72 = arith.constant dense<0xFF800000> : vector<8xf32>
    %199 = vector.multi_reduction <maximumf>, %198, %cst_72 [1] : vector<8x8xf32> to vector<8xf32>
    %200 = vector.shape_cast %199 : vector<8xf32> to vector<8x1xf32>
    %201 = vector.broadcast %200 : vector<8x1xf32> to vector<8x8xf32>
    %202 = arith.subf %198, %201 : vector<8x8xf32>
    %203 = math.exp %202 : vector<8x8xf32>
    %cst_73 = arith.constant dense<0.000000e+00> : vector<8xf32>
    %204 = vector.multi_reduction <add>, %203, %cst_73 [1] : vector<8x8xf32> to vector<8xf32>
    %205 = vector.shape_cast %204 : vector<8xf32> to vector<8x1xf32>
    %206 = tpu.reciprocal %205 {approx = true} : vector<8x1xf32> -> vector<8x1xf32>
    %207 = vector.broadcast %206 : vector<8x1xf32> to vector<8x8xf32>
    %208 = arith.mulf %203, %207 : vector<8x8xf32>
    %cst_74 = arith.constant dense<0.000000e+00> : vector<8x8xf32>
    %209 = tpu.matmul %208, %195, %cst_74 {dimension_numbers = #tpu.dot_dimension_numbers<[1], [0], [0], [1], [0, 0, 1, 1], [], []>} : vector<8x8xf32>, vector<8x8xf32>, vector<8x8xf32> -> vector<8x8xf32>
    %210 = vector.extract_strided_slice %6 {offsets = [8, 0], sizes = [8, 32], strides = [1, 1]} : vector<32x32xf32> to vector<8x32xf32>
    %cst_75 = arith.constant dense<0.000000e+00> : vector<8x32xf32>
    %211 = tpu.matmul %209, %210, %cst_75 {dimension_numbers = #tpu.dot_dimension_numbers<[1], [0], [0], [1], [0, 0, 1, 1], [], []>} : vector<8x8xf32>, vector<8x32xf32>, vector<8x32xf32> -> vector<8x32xf32>
    %212 = arith.addf %192, %211 : vector<8x32xf32>
    %213 = vector.extract_strided_slice %170 {offsets = [0, 16], sizes = [8, 8], strides = [1, 1]} : vector<8x32xf32> to vector<8x8xf32>
    %214 = vector.extract_strided_slice %171 {offsets = [0, 16], sizes = [8, 8], strides = [1, 1]} : vector<8x32xf32> to vector<8x8xf32>
    %215 = vector.extract_strided_slice %169 {offsets = [0, 16], sizes = [8, 8], strides = [1, 1]} : vector<8x32xf32> to vector<8x8xf32>
    %cst_76 = arith.constant dense<0.000000e+00> : vector<8x8xf32>
    %216 = tpu.matmul %213, %214, %cst_76 {dimension_numbers = #tpu.dot_dimension_numbers<[1], [1], [0], [0], [0, 0, 1, 0], [], []>} : vector<8x8xf32>, vector<8x8xf32>, vector<8x8xf32> -> vector<8x8xf32>
    %cst_77 = arith.constant 0.353553385 : f32
    %217 = vector.broadcast %cst_77 : f32 to vector<8x8xf32>
    %218 = arith.mulf %216, %217 : vector<8x8xf32>
    %cst_78 = arith.constant dense<0xFF800000> : vector<8xf32>
    %219 = vector.multi_reduction <maximumf>, %218, %cst_78 [1] : vector<8x8xf32> to vector<8xf32>
    %220 = vector.shape_cast %219 : vector<8xf32> to vector<8x1xf32>
    %221 = vector.broadcast %220 : vector<8x1xf32> to vector<8x8xf32>
    %222 = arith.subf %218, %221 : vector<8x8xf32>
    %223 = math.exp %222 : vector<8x8xf32>
    %cst_79 = arith.constant dense<0.000000e+00> : vector<8xf32>
    %224 = vector.multi_reduction <add>, %223, %cst_79 [1] : vector<8x8xf32> to vector<8xf32>
    %225 = vector.shape_cast %224 : vector<8xf32> to vector<8x1xf32>
    %226 = tpu.reciprocal %225 {approx = true} : vector<8x1xf32> -> vector<8x1xf32>
    %227 = vector.broadcast %226 : vector<8x1xf32> to vector<8x8xf32>
    %228 = arith.mulf %223, %227 : vector<8x8xf32>
    %cst_80 = arith.constant dense<0.000000e+00> : vector<8x8xf32>
    %229 = tpu.matmul %228, %215, %cst_80 {dimension_numbers = #tpu.dot_dimension_numbers<[1], [0], [0], [1], [0, 0, 1, 1], [], []>} : vector<8x8xf32>, vector<8x8xf32>, vector<8x8xf32> -> vector<8x8xf32>
    %230 = vector.extract_strided_slice %6 {offsets = [16, 0], sizes = [8, 32], strides = [1, 1]} : vector<32x32xf32> to vector<8x32xf32>
    %cst_81 = arith.constant dense<0.000000e+00> : vector<8x32xf32>
    %231 = tpu.matmul %229, %230, %cst_81 {dimension_numbers = #tpu.dot_dimension_numbers<[1], [0], [0], [1], [0, 0, 1, 1], [], []>} : vector<8x8xf32>, vector<8x32xf32>, vector<8x32xf32> -> vector<8x32xf32>
    %232 = arith.addf %212, %231 : vector<8x32xf32>
    %233 = vector.extract_strided_slice %170 {offsets = [0, 24], sizes = [8, 8], strides = [1, 1]} : vector<8x32xf32> to vector<8x8xf32>
    %234 = vector.extract_strided_slice %171 {offsets = [0, 24], sizes = [8, 8], strides = [1, 1]} : vector<8x32xf32> to vector<8x8xf32>
    %235 = vector.extract_strided_slice %169 {offsets = [0, 24], sizes = [8, 8], strides = [1, 1]} : vector<8x32xf32> to vector<8x8xf32>
    %cst_82 = arith.constant dense<0.000000e+00> : vector<8x8xf32>
    %236 = tpu.matmul %233, %234, %cst_82 {dimension_numbers = #tpu.dot_dimension_numbers<[1], [1], [0], [0], [0, 0, 1, 0], [], []>} : vector<8x8xf32>, vector<8x8xf32>, vector<8x8xf32> -> vector<8x8xf32>
    %cst_83 = arith.constant 0.353553385 : f32
    %237 = vector.broadcast %cst_83 : f32 to vector<8x8xf32>
    %238 = arith.mulf %236, %237 : vector<8x8xf32>
    %cst_84 = arith.constant dense<0xFF800000> : vector<8xf32>
    %239 = vector.multi_reduction <maximumf>, %238, %cst_84 [1] : vector<8x8xf32> to vector<8xf32>
    %240 = vector.shape_cast %239 : vector<8xf32> to vector<8x1xf32>
    %241 = vector.broadcast %240 : vector<8x1xf32> to vector<8x8xf32>
    %242 = arith.subf %238, %241 : vector<8x8xf32>
    %243 = math.exp %242 : vector<8x8xf32>
    %cst_85 = arith.constant dense<0.000000e+00> : vector<8xf32>
    %244 = vector.multi_reduction <add>, %243, %cst_85 [1] : vector<8x8xf32> to vector<8xf32>
    %245 = vector.shape_cast %244 : vector<8xf32> to vector<8x1xf32>
    %246 = tpu.reciprocal %245 {approx = true} : vector<8x1xf32> -> vector<8x1xf32>
    %247 = vector.broadcast %246 : vector<8x1xf32> to vector<8x8xf32>
    %248 = arith.mulf %243, %247 : vector<8x8xf32>
    %cst_86 = arith.constant dense<0.000000e+00> : vector<8x8xf32>
    %249 = tpu.matmul %248, %235, %cst_86 {dimension_numbers = #tpu.dot_dimension_numbers<[1], [0], [0], [1], [0, 0, 1, 1], [], []>} : vector<8x8xf32>, vector<8x8xf32>, vector<8x8xf32> -> vector<8x8xf32>
    %250 = vector.extract_strided_slice %6 {offsets = [24, 0], sizes = [8, 32], strides = [1, 1]} : vector<32x32xf32> to vector<8x32xf32>
    %cst_87 = arith.constant dense<0.000000e+00> : vector<8x32xf32>
    %251 = tpu.matmul %249, %250, %cst_87 {dimension_numbers = #tpu.dot_dimension_numbers<[1], [0], [0], [1], [0, 0, 1, 1], [], []>} : vector<8x8xf32>, vector<8x32xf32>, vector<8x32xf32> -> vector<8x32xf32>
    %252 = arith.addf %232, %251 : vector<8x32xf32>
    %253 = vector.broadcast %7 : vector<1x32xf32> to vector<8x32xf32>
    %254 = arith.addf %252, %253 : vector<8x32xf32>
    %255 = arith.addf %3, %254 : vector<8x32xf32>
    %256 = vector.extract_strided_slice %8 {offsets = [4, 0], sizes = [1, 32], strides = [1, 1]} : vector<8x32xf32> to vector<1x32xf32>
    %257 = vector.extract_strided_slice %8 {offsets = [5, 0], sizes = [1, 32], strides = [1, 1]} : vector<8x32xf32> to vector<1x32xf32>
    %cst_88 = arith.constant dense<0.000000e+00> : vector<8xf32>
    %258 = vector.multi_reduction <add>, %255, %cst_88 [1] : vector<8x32xf32> to vector<8xf32>
    %259 = vector.shape_cast %258 : vector<8xf32> to vector<8x1xf32>
    %cst_89 = arith.constant 3.200000e+01 : f32
    %260 = vector.broadcast %cst_89 : f32 to vector<8x1xf32>
    %261 = arith.divf %259, %260 : vector<8x1xf32>
    %262 = vector.broadcast %261 : vector<8x1xf32> to vector<8x32xf32>
    %263 = arith.subf %255, %262 : vector<8x32xf32>
    %264 = arith.mulf %263, %263 : vector<8x32xf32>
    %cst_90 = arith.constant dense<0.000000e+00> : vector<8xf32>
    %265 = vector.multi_reduction <add>, %264, %cst_90 [1] : vector<8x32xf32> to vector<8xf32>
    %266 = vector.shape_cast %265 : vector<8xf32> to vector<8x1xf32>
    %cst_91 = arith.constant 3.200000e+01 : f32
    %267 = vector.broadcast %cst_91 : f32 to vector<8x1xf32>
    %268 = arith.divf %266, %267 : vector<8x1xf32>
    %269 = vector.broadcast %261 : vector<8x1xf32> to vector<8x32xf32>
    %270 = arith.subf %255, %269 : vector<8x32xf32>
    %cst_92 = arith.constant 9.99999974E-6 : f32
    %271 = vector.broadcast %cst_92 : f32 to vector<8x1xf32>
    %272 = arith.addf %268, %271 : vector<8x1xf32>
    %273 = math.rsqrt %272 : vector<8x1xf32>
    %274 = vector.broadcast %273 : vector<8x1xf32> to vector<8x32xf32>
    %275 = arith.mulf %270, %274 : vector<8x32xf32>
    %276 = vector.broadcast %256 : vector<1x32xf32> to vector<8x32xf32>
    %277 = arith.mulf %275, %276 : vector<8x32xf32>
    %278 = vector.broadcast %257 : vector<1x32xf32> to vector<8x32xf32>
    %279 = arith.addf %277, %278 : vector<8x32xf32>
    %c0_93 = arith.constant 0 : index
    %c0_94 = arith.constant 0 : index
    %280 = vector.load %arg12[%c0_93, %c0_94] : memref<32x64xf32, #tpu.memory_space<vmem>>, vector<32x64xf32>
    %cst_95 = arith.constant dense<0.000000e+00> : vector<8x64xf32>
    %281 = tpu.matmul %255, %280, %cst_95 {dimension_numbers = #tpu.dot_dimension_numbers<[1], [0], [0], [1], [0, 0, 1, 1], [], []>} : vector<8x32xf32>, vector<32x64xf32>, vector<8x64xf32> -> vector<8x64xf32>
    %c0_96 = arith.constant 0 : index
    %c0_97 = arith.constant 0 : index
    %282 = vector.load %arg13[%c0_96, %c0_97] : memref<1x64xf32, #tpu.memory_space<vmem>>, vector<1x64xf32>
    %283 = vector.broadcast %282 : vector<1x64xf32> to vector<8x64xf32>
    %284 = arith.addf %281, %283 : vector<8x64xf32>
    %cst_98 = arith.constant 0.000000e+00 : f32
    %285 = vector.broadcast %cst_98 : f32 to vector<8x64xf32>
    %286 = arith.maximumf %284, %285 : vector<8x64xf32>
    %c0_99 = arith.constant 0 : index
    %c0_100 = arith.constant 0 : index
    %287 = vector.load %arg14[%c0_99, %c0_100] : memref<64x32xf32, #tpu.memory_space<vmem>>, vector<64x32xf32>
    %cst_101 = arith.constant dense<0.000000e+00> : vector<8x32xf32>
    %288 = tpu.matmul %286, %287, %cst_101 {dimension_numbers = #tpu.dot_dimension_numbers<[1], [0], [0], [1], [0, 0, 1, 1], [], []>} : vector<8x64xf32>, vector<64x32xf32>, vector<8x32xf32> -> vector<8x32xf32>
    %c0_102 = arith.constant 0 : index
    %c0_103 = arith.constant 0 : index
    %289 = vector.load %arg15[%c0_102, %c0_103] : memref<1x32xf32, #tpu.memory_space<vmem>>, vector<1x32xf32>
    %290 = vector.broadcast %289 : vector<1x32xf32> to vector<8x32xf32>
    %291 = arith.addf %288, %290 : vector<8x32xf32>
    %292 = arith.addf %279, %291 : vector<8x32xf32>
    %293 = vector.extract_strided_slice %8 {offsets = [6, 0], sizes = [1, 32], strides = [1, 1]} : vector<8x32xf32> to vector<1x32xf32>
    %294 = vector.extract_strided_slice %8 {offsets = [7, 0], sizes = [1, 32], strides = [1, 1]} : vector<8x32xf32> to vector<1x32xf32>
    %cst_104 = arith.constant dense<0.000000e+00> : vector<8xf32>
    %295 = vector.multi_reduction <add>, %292, %cst_104 [1] : vector<8x32xf32> to vector<8xf32>
    %296 = vector.shape_cast %295 : vector<8xf32> to vector<8x1xf32>
    %cst_105 = arith.constant 3.200000e+01 : f32
    %297 = vector.broadcast %cst_105 : f32 to vector<8x1xf32>
    %298 = arith.divf %296, %297 : vector<8x1xf32>
    %299 = vector.broadcast %298 : vector<8x1xf32> to vector<8x32xf32>
    %300 = arith.subf %292, %299 : vector<8x32xf32>
    %301 = arith.mulf %300, %300 : vector<8x32xf32>
    %cst_106 = arith.constant dense<0.000000e+00> : vector<8xf32>
    %302 = vector.multi_reduction <add>, %301, %cst_106 [1] : vector<8x32xf32> to vector<8xf32>
    %303 = vector.shape_cast %302 : vector<8xf32> to vector<8x1xf32>
    %cst_107 = arith.constant 3.200000e+01 : f32
    %304 = vector.broadcast %cst_107 : f32 to vector<8x1xf32>
    %305 = arith.divf %303, %304 : vector<8x1xf32>
    %306 = vector.broadcast %298 : vector<8x1xf32> to vector<8x32xf32>
    %307 = arith.subf %292, %306 : vector<8x32xf32>
    %cst_108 = arith.constant 9.99999974E-6 : f32
    %308 = vector.broadcast %cst_108 : f32 to vector<8x1xf32>
    %309 = arith.addf %305, %308 : vector<8x1xf32>
    %310 = math.rsqrt %309 : vector<8x1xf32>
    %311 = vector.broadcast %310 : vector<8x1xf32> to vector<8x32xf32>
    %312 = arith.mulf %307, %311 : vector<8x32xf32>
    %313 = vector.broadcast %293 : vector<1x32xf32> to vector<8x32xf32>
    %314 = arith.mulf %312, %313 : vector<8x32xf32>
    %315 = vector.broadcast %294 : vector<1x32xf32> to vector<8x32xf32>
    %316 = arith.addf %314, %315 : vector<8x32xf32>
    %c0_109 = arith.constant 0 : index
    %c0_110 = arith.constant 0 : index
    %c0_111 = arith.constant 0 : index
    %317 = vector.load %arg16[%c0_109, %c0_110, %c0_111] : memref<1x8x32xf32, #tpu.memory_space<vmem>>, vector<1x8x32xf32>
    %318 = vector.shape_cast %317 : vector<1x8x32xf32> to vector<8x32xf32>
    %319 = vector.shape_cast %159 : vector<8x32xf32> to vector<1x8x32xf32>
    tpu.vector_store %arg16[%c0_109, %c0_110, %c0_111], %319 {strides = array<i32>} : memref<1x8x32xf32, #tpu.memory_space<vmem>>, vector<1x8x32xf32>,
    %c0_112 = arith.constant 0 : index
    %c0_113 = arith.constant 0 : index
    %c0_114 = arith.constant 0 : index
    %320 = vector.load %arg17[%c0_112, %c0_113, %c0_114] : memref<1x8x32xf32, #tpu.memory_space<vmem>>, vector<1x8x32xf32>
    %321 = vector.shape_cast %320 : vector<1x8x32xf32> to vector<8x32xf32>
    %322 = vector.shape_cast %316 : vector<8x32xf32> to vector<1x8x32xf32>
    tpu.vector_store %arg17[%c0_112, %c0_113, %c0_114], %322 {strides = array<i32>} : memref<1x8x32xf32, #tpu.memory_space<vmem>>, vector<1x8x32xf32>,
    return
  }
  func.func @transform_0(%arg0: i32) -> (i32, i32, i32) {
    %c0_i32 = arith.constant 0 : i32
    %c0_i32_0 = arith.constant 0 : i32
    %c0_i32_1 = arith.constant 0 : i32
    return %arg0, %c0_i32, %c0_i32_0 : i32, i32, i32
  }
  func.func @transform_1(%arg0: i32) -> (i32, i32, i32) {
    %c0_i32 = arith.constant 0 : i32
    %c0_i32_0 = arith.constant 0 : i32
    %c0_i32_1 = arith.constant 0 : i32
    return %arg0, %c0_i32, %c0_i32_0 : i32, i32, i32
  }
  func.func @transform_2(%arg0: i32) -> (i32, i32) {
    %c0_i32 = arith.constant 0 : i32
    %c0_i32_0 = arith.constant 0 : i32
    %c0_i32_1 = arith.constant 0 : i32
    return %c0_i32, %c0_i32_0 : i32, i32
  }
  func.func @transform_3(%arg0: i32) -> (i32, i32) {
    %c0_i32 = arith.constant 0 : i32
    %c0_i32_0 = arith.constant 0 : i32
    %c0_i32_1 = arith.constant 0 : i32
    return %c0_i32, %c0_i32_0 : i32, i32
  }
  func.func @transform_4(%arg0: i32) -> (i32, i32) {
    %c0_i32 = arith.constant 0 : i32
    %c0_i32_0 = arith.constant 0 : i32
    %c0_i32_1 = arith.constant 0 : i32
    return %c0_i32, %c0_i32_0 : i32, i32
  }
  func.func @transform_5(%arg0: i32) -> (i32, i32) {
    %c0_i32 = arith.constant 0 : i32
    %c0_i32_0 = arith.constant 0 : i32
    %c0_i32_1 = arith.constant 0 : i32
    return %c0_i32, %c0_i32_0 : i32, i32
  }
  func.func @transform_6(%arg0: i32) -> (i32, i32) {
    %c0_i32 = arith.constant 0 : i32
    %c0_i32_0 = arith.constant 0 : i32
    %c0_i32_1 = arith.constant 0 : i32
    return %c0_i32, %c0_i32_0 : i32, i32
  }
  func.func @transform_7(%arg0: i32) -> (i32, i32) {
    %c0_i32 = arith.constant 0 : i32
    %c0_i32_0 = arith.constant 0 : i32
    %c0_i32_1 = arith.constant 0 : i32
    return %c0_i32, %c0_i32_0 : i32, i32
  }
  func.func @transform_8(%arg0: i32) -> (i32, i32) {
    %c0_i32 = arith.constant 0 : i32
    %c0_i32_0 = arith.constant 0 : i32
    %c0_i32_1 = arith.constant 0 : i32
    return %c0_i32, %c0_i32_0 : i32, i32
  }
  func.func @transform_9(%arg0: i32) -> (i32, i32) {
    %c0_i32 = arith.constant 0 : i32
    %c0_i32_0 = arith.constant 0 : i32
    %c0_i32_1 = arith.constant 0 : i32
    return %c0_i32, %c0_i32_0 : i32, i32
  }
  func.func @transform_10(%arg0: i32) -> (i32, i32) {
    %c0_i32 = arith.constant 0 : i32
    %c0_i32_0 = arith.constant 0 : i32
    %c0_i32_1 = arith.constant 0 : i32
    return %c0_i32, %c0_i32_0 : i32, i32
  }
  func.func @transform_11(%arg0: i32) -> (i32, i32) {
    %c0_i32 = arith.constant 0 : i32
    %c0_i32_0 = arith.constant 0 : i32
    %c0_i32_1 = arith.constant 0 : i32
    return %c0_i32, %c0_i32_0 : i32, i32
  }
  func.func @transform_12(%arg0: i32) -> (i32, i32) {
    %c0_i32 = arith.constant 0 : i32
    %c0_i32_0 = arith.constant 0 : i32
    %c0_i32_1 = arith.constant 0 : i32
    return %c0_i32, %c0_i32_0 : i32, i32
  }
  func.func @transform_13(%arg0: i32) -> (i32, i32) {
    %c0_i32 = arith.constant 0 : i32
    %c0_i32_0 = arith.constant 0 : i32
    %c0_i32_1 = arith.constant 0 : i32
    return %c0_i32, %c0_i32_0 : i32, i32
  }
  func.func @transform_14(%arg0: i32) -> (i32, i32) {
    %c0_i32 = arith.constant 0 : i32
    %c0_i32_0 = arith.constant 0 : i32
    %c0_i32_1 = arith.constant 0 : i32
    return %c0_i32, %c0_i32_0 : i32, i32
  }
  func.func @transform_15(%arg0: i32) -> (i32, i32, i32) {
    %c0_i32 = arith.constant 0 : i32
    %c0_i32_0 = arith.constant 0 : i32
    %c0_i32_1 = arith.constant 0 : i32
    return %arg0, %c0_i32, %c0_i32_0 : i32, i32, i32
  }
  func.func @transform_16(%arg0: i32) -> (i32, i32, i32) {
    %c0_i32 = arith.constant 0 : i32
    %c0_i32_0 = arith.constant 0 : i32
    %c0_i32_1 = arith.constant 0 : i32
    return %arg0, %c0_i32, %c0_i32_0 : i32, i32, i32
  }
}

</mosaic_0001>

<bundles_post_ra>
// kernel: transformer_motion_encoder_layer.1
= control target key start
LH: loop header
LB: loop body
LE: loop exit
PB: predicated region body
PF: predicated region fallthrough
CT: control target
= control target key end

     0   :  { %s1946_s21 = smov 0   ;;  %s2281_s0 = inlined_call_operand.vmem [shape: f32[2,8,32], index: 0, kind: input, shape index: {}]   ;;  %s2282_s1 = inlined_call_operand.vmem [shape: f32[2,8,32], index: 1, kind: input, shape index: {}]   ;;  %s2283_s2 = inlined_call_operand.vmem [shape: f32[32,96], index: 2, kind: input, shape index: {}]   ;;  %s2284_s3 = inlined_call_operand.vmem [shape: f32[1,96], index: 3, kind: input, shape index: {}]   ;;  %s2285_s4 = inlined_call_operand.vmem [shape: f32[32,32], index: 4, kind: input, shape index: {}]   ;;  %s2286_s5 = inlined_call_operand.vmem [shape: f32[1,32], index: 5, kind: input, shape index: {}]   ;;  %s2287_s6 = inlined_call_operand.vmem [shape: f32[8,32], index: 6, kind: input, shape index: {}]   ;;  %s2288_s7 = inlined_call_operand.vmem [shape: f32[32,64], index: 7, kind: input, shape index: {}]   ;;  %s2289_s8 = inlined_call_operand.vmem [shape: f32[1,64], index: 8, kind: input, shape index: {}]   ;;  %s2290_s9 = inlined_call_operand.vmem [shape: f32[64,32], index: 9, kind: input, shape index: {}]   ;;  %s2291_s10 = inlined_call_operand.vmem [shape: f32[1,32], index: 10, kind: input, shape index: {}]   ;;  %s2292_s11 = inlined_call_operand.vmem [shape: f32[32,64], index: 11, kind: input, shape index: {}]   ;;  %s2293_s12 = inlined_call_operand.vmem [shape: f32[1,64], index: 12, kind: input, shape index: {}]   ;;  %s2294_s13 = inlined_call_operand.vmem [shape: f32[64,32], index: 13, kind: input, shape index: {}]   ;;  %s2295_s14 = inlined_call_operand.vmem [shape: f32[1,32], index: 14, kind: input, shape index: {}]   ;;  %s2296_s15 = inlined_call_operand.vmem [shape: f32[2,8,32], index: 15, kind: output, shape index: {0}]   ;;  %s2297_s16 = inlined_call_operand.vmem [shape: f32[2,8,32], index: 16, kind: output, shape index: {1}]  }
   0x1   :  { %2303 = sst [smem:[#allocation2_spill]] %s2281_s0 }
   0x2 LB: > { %s1713_s22 = sadd.s32 4294967295, %s1847_s21   ;;  %p1717_p0 = scmp.ge.s32.totalorder %s1847_s21, 1  ;;  %s1847_s21 = sphi %s1946_s21, %s27_s21  }
   0x3   : > { %p473_p1 = scmp.lt.s32.totalorder %s1847_s21, 3 }
   0x5   : > { %p474_p2 = pnand %p1717_p0, %p473_p1 }
   0x6   : > { %p529_p3 = scmp.lt.s32.totalorder (!%p474_p2), %s1713_s22, 1  ;;  %s2304_s19 = sld [smem:[#allocation2_spill]] (!%p474_p2) }
   0x7   : > { %477 = sbr.rel (%p474_p2) target bundleno = 3395 (0xd43), region = 80  ;;  %s1850_s25 = smov (!%p474_p2), 96  }
   0x8   : > { %s1851_s26 = smov (!%p474_p2), 88   ;;  %s1852_s27 = smov (!%p474_p2), 56  }
   0x9   : > { %s2301_s28 = smov (!%p474_p2), 112   ;;  %s1854_s29 = smov (!%p474_p2), 80  }
   0xa   : > { %s2298_s30 = smov (!%p474_p2), 104   ;;  %s1856_s17 = smov (!%p474_p2), 64  }
   0xb   : > { %s2300_s18 = smov (!%p474_p2), 72   ;;  %s2305_s23 = smov (!%p474_p2), 112  }
   0xc   : > { %v1957_v0 = vld [vmem:[%s2283_s2 + $0x18] sm:$0xff]  ;;  %v1962_v1 = vld [vmem:[%s2283_s2 + $0x10] sm:$0xff]  ;;  %v1968_v2 = vld [vmem:[%s2283_s2 + $0x8] sm:$0xff]  ;;  %s2309_s22 = smov (!%p529_p3, %s1713_s22), 1  ;;  %vm561_vm0 = vcmask 261120   ;;  %vm588_vm1 = vcmask 64512  }
   0xd   : > { %577 = vmatpush.msra.mxu0 %v1957_v0  ;;  %v1974_v3 = vld [vmem:[%s2283_s2] sm:$0xff]  ;;  %s1976_s0 = sshll.u32 %s2309_s22, 3  ;;  %s1849_s22 = smov 120   ;;  %v2038_v41 = vld [vmem:[%s2285_s4 + $0x8] sm:$0xff]  ;;  %vm1025_vm2 = vcmask 523264  }
   0xe   : > { %s532_s20 = scalar_lea.vmem %s2304_s19, %s1976_s0  ;;  %v1991_v5 = vld [vmem:[%s2284_s3] ss:$0 sm:$0xff]  ;;  %s1859_s19 = smov 40  }
   0xf   : > { %578 = vmatpush.msra.mxu0 %v1962_v1  ;;  %v1983_v4 = vld [vmem:[%s532_s20] sm:$0xff] }
  0x10   : > { %v2027_v33 = vld [vmem:[%s2285_s4] sm:$0xff] }
  0x11   : > { %579 = vmatpush.msra.mxu0 %v1968_v2 }
  0x13   : > { %580 = vmatpush.msra.mxu0 %v1974_v3 }
  0x14   : > { %1722 = vmatmul.msk.f32.vlgmr.msra.gmra.mxu0 %vm561_vm0, %v1983_v4 }
  0x91   : > { %v582_v6 = vpop.f32.mrf.mxu0 }
  0x92   : > { %v1994_v7 = vadd.f32 %v1991_v5, %v582_v6 }
  0x94   : > { %651 = vrot.lane.b32.xlu1 %v1994_v7, %s1849_s22  ;;  %586 = vrot.lane.b32.xlu0 %v1994_v7, %s1850_s25 }
  0x9c   : > { %653 = vrot.lane.b32.xlu0 %v1994_v7, %s1851_s26 }
 0x106   : > { %v587_v8 = vpop.permute.xlu0 %586  ;;  %v652_v10 = vpop.permute.xlu1 %651 }
 0x107   : > { %1723 = vmatpush.xpose.msk.msra.mxu1 %vm588_vm1, %v587_v8 }
 0x10a   : > { %1724 = vmatmul.msk.f32.vlgmr.msra.gmra.mxu1 %vm588_vm1, %v1994_v7 }
 0x10b   : > { %735 = vmatpush.msrb.mxu1 %v2038_v41 }
 0x10e   : > { %v654_v9 = vpop.permute.xlu0 %653 }
 0x10f   : > { %1726 = vmatpush.xpose.msk.msra.mxu3 %vm588_vm1, %v654_v9 }
 0x112   : > { %1727 = vmatmul.msk.f32.vlgmr.msra.gmra.mxu3 %vm588_vm1, %v652_v10 }
 0x113   : > { %758 = vmatpush.msrb.mxu3 %v2027_v33 }
 0x187   : > { %v610_v11 = vpop.f32.mrf.mxu1 }
 0x188   : > { %v613_v12 = vmul.f32 0.35355338, %v610_v11 }
 0x18a   : > { %v614_v13 = vsel %vm588_vm1, %v613_v12, -inf }
 0x18b   : > { %615 = vmax.xlane.f32.xlu1 %v614_v13 }
 0x195   : > { %v676_v14 = vpop.f32.mrf.mxu3 }
 0x196   : > { %v679_v15 = vmul.f32 0.35355338, %v676_v14  ;;  %v984_v14 = vld [vmem:[%s2288_s7 + $0x18] sm:$0xff] }
 0x198   : > { %v680_v16 = vsel %vm588_vm1, %v679_v15, -inf }
 0x199   : > { %681 = vmax.xlane.f32.xlu0 %v680_v16  ;;  %v982_v16 = vld [vmem:[%s2288_s7 + $0x8] sm:$0xff] }
 0x1a4   : > { %691 = vrot.lane.b32.xlu1 %v1994_v7, %s1852_s27  ;;  %s1858_s27 = smov 48  }
 0x1ac   : > { %763 = vrot.lane.b32.xlu1 %v1994_v7, %s2301_s28  ;;  %s2307_s28 = smov 104  }
 0x1ad   : > { %765 = vrot.lane.b32.xlu0 %v1994_v7, %s1854_s29 }
 0x1b5   : > { %853 = vrot.lane.b32.xlu0 %v1994_v7, %s2298_s30 }
 0x1fe   : > { %v616_v17 = vpop.xlane.xlu1 %615 }
 0x1ff   : > { %v617_v18 = vsub.f32 %v613_v12, %v616_v17  ;;  %v2063_v12 = vld [vmem:[%s2285_s4 + $0x18] sm:$0xff]  ;;  %v981_v17 = vld [vmem:[%s2288_s7] sm:$0xff] }
 0x201   : > { %v618_v19 = vmul.f32 1.442695, %v617_v18  ;;  %v1783_v18 = vpack.i.bf16 %v1962_v1, %v1957_v0 }
 0x203   : > { %1799 = vpow2.f32 %v618_v19  ;;  %v1020_v19 = vld [vmem:[%s2290_s9 + $0x38] sm:$0xff] }
 0x209   : > { %v1800_v20 = vpop.eup %1799 }
 0x20a   : > { %v620_v21 = vsel %vm588_vm1, %v1800_v20, 0.0 }
 0x20b   : > { %621 = vadd.xlane.f32.xlu2 %v620_v21  ;;  %v1018_v21 = vld [vmem:[%s2290_s9 + $0x28] sm:$0xff] }
 0x20c   : > { %v682_v22 = vpop.xlane.xlu0 %681 }
 0x20d   : > { %v683_v23 = vsub.f32 %v679_v15, %v682_v22  ;;  %v983_v15 = vld [vmem:[%s2288_s7 + $0x10] sm:$0xff]  ;;  %v1016_v22 = vld [vmem:[%s2290_s9 + $0x18] sm:$0xff] }
 0x20f   : > { %v684_v24 = vmul.f32 1.442695, %v683_v23 }
 0x211   : > { %1801 = vpow2.f32 %v684_v24 }
 0x216   : > { %v692_v31 = vpop.permute.xlu1 %691 }
 0x217   : > { %v1802_v25 = vpop.eup %1801 }
 0x218   : > { %v686_v26 = vsel %vm588_vm1, %v1802_v25, 0.0 }
 0x21e   : > { %v764_v38 = vpop.permute.xlu1 %763 }
 0x21f   : > { %v766_v32 = vpop.permute.xlu0 %765 }
 0x223   : > { %625 = vrot.lane.b32.xlu2 %v1994_v7, %s1856_s17 }
 0x227   : > { %v854_v40 = vpop.permute.xlu0 %853 }
 0x24c   : > { %687 = vadd.xlane.f32.xlu2 %v686_v26 }
 0x264   : > { %855 = vrot.lane.b32.xlu2 %v1994_v7, %s2300_s18 }
 0x27e   : > { %v622_v27 = vpop.xlane.xlu2 %621 }
 0x27f   : > { %1803 = vrcp.f32 %v622_v27 }
 0x285   : > { %v1804_v28 = vpop.eup %1803 }
 0x286   : > { %v626_v29 = vpop.permute.xlu2 %625  ;;  %v624_v30 = vmul.f32 %v1804_v28, %v1800_v20  ;;  %v1019_v20 = vld [vmem:[%s2290_s9 + $0x30] sm:$0xff] }
 0x287   : > { %646 = vmatpush.msra.mxu2 %v626_v29 }
 0x288   : > { %1725 = vmatmul.msk.f32.vlgmr.msra.gmra.mxu2 %vm588_vm1, %v624_v30  ;;  %v1015_v30 = vld [vmem:[%s2290_s9 + $0x10] sm:$0xff] }
 0x289   : > { %712 = vmatpush.msrb.mxu2 %v692_v31  ;;  %v1014_v31 = vld [vmem:[%s2290_s9 + $0x8] sm:$0xff] }
 0x28b   : > { %1731 = vmatpush.xpose.msk.msra.mxu2 %vm588_vm1, %v766_v32  ;;  %v1795_v32 = vld [vmem:[%s2289_s8] ss:$0 sm:$0xff] }
 0x2bf   : > { %v688_v34 = vpop.xlane.xlu2 %687 }
 0x2c0   : > { %1805 = vrcp.f32 %v688_v34 }
 0x2c6   : > { %v1806_v35 = vpop.eup %1805 }
 0x2c7   : > { %v856_v36 = vpop.permute.xlu2 %855  ;;  %v690_v37 = vmul.f32 %v1806_v35, %v1802_v25 }
 0x2c8   : > { %1735 = vmatpush.xpose.msk.msra.mxu3 %vm588_vm1, %v856_v36 }
 0x2c9   : > { %1728 = vmatmul.msk.f32.vlgmr.msrb.gmra.mxu2 %vm588_vm1, %v690_v37 }
 0x2d1   : > { %1732 = vmatmul.msk.f32.vlgmr.msra.gmra.mxu2 %vm588_vm1, %v764_v38 }
 0x30b   : > { %v648_v39 = vpop.f32.mrf.mxu2 }
 0x30c   : > { %1730 = vmatmul.msk.f32.vlgmr.msrb.gmra.mxu3 %vm588_vm1, %v648_v39 }
 0x30d   : > { %1037 = vmatpush.msrb.mxu3 %v1020_v19 }
 0x30f   : > { %1038 = vmatpush.msrb.mxu3 %v1019_v20 }
 0x311   : > { %1039 = vmatpush.msrb.mxu3 %v1018_v21 }
 0x314   : > { %1736 = vmatmul.msk.f32.vlgmr.msra.gmra.mxu3 %vm588_vm1, %v854_v40 }
 0x34c   : > { %v714_v42 = vpop.f32.mrf.mxu2 }
 0x34d   : > { %1729 = vmatmul.msk.f32.vlgmr.msrb.gmra.mxu1 %vm588_vm1, %v714_v42 }
 0x354   : > { %v788_v43 = vpop.f32.mrf.mxu2 }
 0x355   : > { %v791_v44 = vmul.f32 0.35355338, %v788_v43 }
 0x357   : > { %v792_v45 = vsel %vm588_vm1, %v791_v44, -inf }
 0x358   : > { %793 = vmax.xlane.f32.xlu1 %v792_v45 }
 0x38f   : > { %v2043_v46 = vpop.f32.mrf.mxu3 }
 0x397   : > { %v878_v47 = vpop.f32.mrf.mxu3 }
 0x398   : > { %v881_v48 = vmul.f32 0.35355338, %v878_v47 }
 0x39a   : > { %v882_v49 = vsel %vm588_vm1, %v881_v48, -inf }
 0x39b   : > { %883 = vmax.xlane.f32.xlu0 %v882_v49 }
 0x3af   : > { %803 = vrot.lane.b32.xlu0 %v1994_v7, %s1858_s27 }
 0x3b7   : > { %1784 = vrot.lane.b32.xlu0 %v1783_v18, %s1856_s17 }
 0x3ca   : > { %v737_v23 = vpop.f32.mrf.mxu1 }
 0x3cb   : > { %v794_v50 = vpop.xlane.xlu1 %793  ;;  %v761_v25 = vadd.f32 %v2043_v46, %v737_v23 }
 0x3cc   : > { %v795_v51 = vsub.f32 %v791_v44, %v794_v50 }
 0x3ce   : > { %v796_v52 = vmul.f32 1.442695, %v795_v51 }
 0x3d0   : > { %1807 = vpow2.f32 %v796_v52 }
 0x3d6   : > { %v1808_v53 = vpop.eup %1807 }
 0x3d7   : > { %v798_v54 = vsel %vm588_vm1, %v1808_v53, 0.0 }
 0x3d8   : > { %799 = vadd.xlane.f32.xlu2 %v798_v54 }
 0x40e   : > { %v884_v55 = vpop.xlane.xlu0 %883 }
 0x40f   : > { %v885_v56 = vsub.f32 %v881_v48, %v884_v55 }
 0x411   : > { %v886_v57 = vmul.f32 1.442695, %v885_v56 }
 0x413   : > { %1809 = vpow2.f32 %v886_v57 }
 0x419   : > { %v1810_v58 = vpop.eup %1809 }
 0x41a   : > { %v888_v59 = vsel %vm588_vm1, %v1810_v58, 0.0 }
 0x41b   : > { %889 = vadd.xlane.f32.xlu1 %v888_v59 }
 0x421   : > { %v804_v60 = vpop.permute.xlu0 %803 }
 0x422   : > { %824 = vmatpush.msrb.mxu2 %v804_v60 }
 0x424   : > { %937 = vmatpush.msra.mxu2 %v2063_v12 }
 0x429   : > { %v1785_v39 = vpop.permute.xlu0 %1784 }
 0x42a   : > { %v1787_v40 = vunpack.i.h.bf16 %v1785_v39 }
 0x434   : > { %893 = vrot.lane.b32.xlu1 %v1994_v7, %s1859_s19  ;;  %v554_v7 = vld [vmem:[%s2285_s4 + $0x10] sm:$0xff] }
 0x435   : > { %847 = vmatpush.msra.mxu1 %v554_v7 }
 0x437   : > { %1004 = vmatpush.msrb.mxu1 %v984_v14 }
 0x439   : > { %1005 = vmatpush.msrb.mxu1 %v983_v15 }
 0x43b   : > { %1006 = vmatpush.msrb.mxu1 %v982_v16 }
 0x43d   : > { %1007 = vmatpush.msrb.mxu1 %v981_v17 }
 0x44b   : > { %v800_v61 = vpop.xlane.xlu2 %799 }
 0x44c   : > { %1811 = vrcp.f32 %v800_v61 }
 0x452   : > { %v1812_v62 = vpop.eup %1811 }
 0x453   : > { %v802_v63 = vmul.f32 %v1812_v62, %v1808_v53 }
 0x455   : > { %1733 = vmatmul.msk.f32.vlgmr.msrb.gmra.mxu2 %vm588_vm1, %v802_v63 }
 0x48e   : > { %v890_v6 = vpop.xlane.xlu1 %889 }
 0x48f   : > { %1813 = vrcp.f32 %v890_v6 }
 0x495   : > { %v1814_v8 = vpop.eup %1813 }
 0x496   : > { %v892_v10 = vmul.f32 %v1814_v8, %v1810_v58 }
 0x4a6   : > { %v894_v9 = vpop.permute.xlu1 %893 }
 0x4a7   : > { %914 = vmatpush.msrb.mxu0 %v894_v9 }
 0x4a8   : > { %1737 = vmatmul.msk.f32.vlgmr.msrb.gmra.mxu0 %vm588_vm1, %v892_v10 }
 0x4a9   : > { %1088 = vmatpush.msra.mxu0 %v1957_v0  ;;  %v1017_v0 = vld [vmem:[%s2290_s9 + $0x20] sm:$0xff] }
 0x4aa   : > { %1040 = vmatpush.msrb.mxu3 %v1017_v0 }
 0x4ab   : > { %1089 = vmatpush.msra.mxu0 %v1962_v1  ;;  %v1788_v1 = vpack.i.bf16 %v1974_v3, %v1968_v2 }
 0x4ac   : > { %1041 = vmatpush.msrb.mxu3 %v1016_v22 }
 0x4ad   : > { %1090 = vmatpush.msra.mxu0 %v1968_v2  ;;  %1789 = vrot.lane.b32.xlu0 %v1788_v1, %s1856_s17  ;;  %v2106_v2 = vld [vmem:[%s2286_s5] ss:$0 sm:$0xff] }
 0x4ae   : > { %1042 = vmatpush.msrb.mxu3 %v1015_v30 }
 0x4af   : > { %1091 = vmatpush.msra.mxu0 %v1974_v3 }
 0x4b0   : > { %1043 = vmatpush.msrb.mxu3 %v1014_v31 }
 0x4b5   : > { %1112 = vrot.lane.b32.xlu0 %v1991_v5, %s1856_s17  ;;  %s536_s17 = scalar_lea.vmem %s2282_s1, %s1976_s0 }
 0x4b6   : > { %v2140_v44 = vld [vmem:[%s536_s17] sm:$0xff] }
 0x4d8   : > { %v826_v11 = vpop.f32.mrf.mxu2 }
 0x4d9   : > { %1734 = vmatmul.msk.f32.vlgmr.msra.gmra.mxu1 %vm588_vm1, %v826_v11 }
 0x525   : > { %v916_v13 = vpop.f32.mrf.mxu0 }
 0x526   : > { %1738 = vmatmul.msk.f32.vlgmr.msra.gmra.mxu2 %vm588_vm1, %v916_v13 }
 0x556   : > { %v849_v24 = vpop.f32.mrf.mxu1 }
 0x557   : > { %v852_v26 = vadd.f32 %v849_v24, %v761_v25 }
 0x5a9   : > { %v939_v3 = vpop.f32.mrf.mxu2 }
 0x5aa   : > { %v942_v27 = vadd.f32 %v939_v3, %v852_v26 }
 0x5ac   : > { %v946_v28 = vadd.f32 %v2106_v2, %v942_v27 }
 0x5ae   : > { %v2110_v29 = vadd.f32 %v946_v28, %v1983_v4  ;;  %v1013_v4 = vld [vmem:[%s2290_s9] sm:$0xff] }
 0x5af   : > { %1044 = vmatpush.msrb.mxu3 %v1013_v4 }
 0x5b0   : > { %1739 = vmatmul.msk.f32.vlgmr.msrb.gmra.mxu1 %vm561_vm0, %v2110_v29  ;;  %1741 = vmatmul.msk.f32.vlgmr.msra.gmra.mxu0 %vm561_vm0, %v2110_v29  ;;  %v948_v1 = vsel %vm561_vm0, %v2110_v29, 0.0 }
 0x5b1   : > { %1285 = vmatpush.msra.mxu3 %v2038_v41  ;;  %v1786_v41 = vunpack.i.l.bf16 %v1785_v39 }
 0x5b3   : > { %1130 = vmatpush.msrb.mxu2 %v1786_v41 }
 0x5b5   : > { %1131 = vmatpush.msrb.mxu2 %v1787_v40 }
 0x62d   : > { %v1009_v34 = vpop.f32.mrf.mxu1  ;;  %v1093_v35 = vpop.f32.mrf.mxu0 }
 0x62e   : > { %v1010_v36 = vadd.f32 %v1795_v32, %v1009_v34  ;;  %v1094_v37 = vadd.f32 %v1991_v5, %v1093_v35  ;;  %v1790_v5 = vpop.permute.xlu0 %1789 }
 0x62f   : > { %v1792_v42 = vunpack.i.h.bf16 %v1790_v5  ;;  %v1791_v43 = vunpack.i.l.bf16 %v1790_v5  ;;  %v1860_v5 = vmov 32.0  }
 0x630   : > { %v1012_v38 = vmax.f32 %v1010_v36, 0.0  ;;  %1202 = vrot.lane.b32.xlu0 %v1094_v37, %s1851_s26  ;;  %1139 = vrot.lane.b32.xlu2 %v1094_v37, %s1850_s25  ;;  %s540_s25 = scalar_lea.vmem %s2296_s15, %s1976_s0 }
 0x631   : > { %1132 = vmatpush.msrb.mxu2 %v1791_v43 }
 0x632   : > { %1740 = vmatmul.msk.f32.vlgmr.msrb.gmra.mxu3 %vm1025_vm2, %v1012_v38 }
 0x633   : > { %1397 = vmatpush.msrb.mxu3 %v554_v7  ;;  %1133 = vmatpush.msrb.mxu2 %v1792_v42 }
 0x634   : > { %1742 = vmatmul.msk.f32.vlgmr.msrb.gmra.mxu2 %vm561_vm0, %v2140_v44 }
 0x636   : > { %v1113_v46 = vpop.permute.xlu0 %1112 }
 0x638   : > { %1200 = vrot.lane.b32.xlu0 %v1094_v37, %s1849_s22 }
 0x640   : > { %1315 = vrot.lane.b32.xlu0 %v1094_v37, %s1854_s29  ;;  %s2306_s29 = smov 72  }
 0x648   : > { %1313 = vrot.lane.b32.xlu0 %v1094_v37, %s2305_s23 }
 0x68a   : > { %v1140_v45 = vpop.permute.xlu2 %1139 }
 0x68b   : > { %1743 = vmatpush.xpose.msk.msra.mxu1 %vm588_vm1, %v1140_v45 }
 0x68e   : > { %1744 = vmatmul.msk.f32.vlgmr.msra.gmra.mxu1 %vm588_vm1, %v1094_v37 }
 0x6a2   : > { %v1203_v47 = vpop.permute.xlu0 %1202 }
 0x6a3   : > { %1746 = vmatpush.xpose.msk.msra.mxu2 %vm588_vm1, %v1203_v47 }
 0x6aa   : > { %v1201_v48 = vpop.permute.xlu0 %1200 }
 0x6ab   : > { %1747 = vmatmul.msk.f32.vlgmr.msra.gmra.mxu2 %vm588_vm1, %v1201_v48 }
 0x6b2   : > { %v1316_v49 = vpop.permute.xlu0 %1315 }
 0x6b3   : > { %1751 = vmatpush.xpose.msk.msrb.mxu2 %vm588_vm1, %v1316_v49 }
 0x6b7   : > { %v1135_v51 = vpop.f32.mrf.mxu2 }
 0x6b8   : > { %v2150_v52 = vadd.f32 %v1135_v51, %v1113_v46 }
 0x6ba   : > { %v1314_v50 = vpop.permute.xlu0 %1313  ;;  %1195 = vmatpush.msrb.mxu0 %v2150_v52 }
 0x6bb   : > { %1752 = vmatmul.msk.f32.vlgmr.msrb.gmra.mxu2 %vm588_vm1, %v1314_v50 }
 0x6bc   : > { %1308 = vmatpush.msra.mxu0 %v2027_v33 }
 0x70b   : > { %v1162_v53 = vpop.f32.mrf.mxu1 }
 0x70c   : > { %v1165_v54 = vmul.f32 0.35355338, %v1162_v53 }
 0x70e   : > { %v1166_v55 = vsel %vm588_vm1, %v1165_v54, -inf }
 0x70f   : > { %1167 = vmax.xlane.f32.xlu1 %v1166_v55 }
 0x728   : > { %1405 = vrot.lane.b32.xlu1 %v1094_v37, %s2306_s29  ;;  %s544_s29 = scalar_lea.vmem %s2297_s16, %s1976_s0 }
 0x72e   : > { %v1225_v56 = vpop.f32.mrf.mxu2 }
 0x72f   : > { %v1228_v57 = vmul.f32 0.35355338, %v1225_v56 }
 0x731   : > { %v1229_v58 = vsel %vm588_vm1, %v1228_v57, -inf }
 0x732   : > { %1230 = vmax.xlane.f32.xlu0 %v1229_v58 }
 0x73e   : > { %v1338_v59 = vpop.f32.mrf.mxu2 }
 0x73f   : > { %v1341_v60 = vmul.f32 0.35355338, %v1338_v59  ;;  %v1523_v59 = vld [vmem:[%s2292_s11 + $0x10] sm:$0xff] }
 0x741   : > { %v1342_v61 = vsel %vm588_vm1, %v1341_v60, -inf }
 0x752   : > { %1343 = vmax.xlane.f32.xlu1 %v1342_v61  ;;  %v1521_v61 = vld [vmem:[%s2292_s11] sm:$0xff] }
 0x782   : > { %v1168_v62 = vpop.xlane.xlu1 %1167 }
 0x783   : > { %v1169_v63 = vsub.f32 %v1165_v54, %v1168_v62  ;;  %v1046_v62 = vpop.f32.mrf.mxu3 }
 0x785   : > { %v1170_v33 = vmul.f32 1.442695, %v1169_v63 }
 0x787   : > { %1815 = vpow2.f32 %v1170_v33 }
 0x78d   : > { %v1816_v6 = vpop.eup %1815 }
 0x78e   : > { %v1172_v8 = vsel %vm588_vm1, %v1816_v6, 0.0 }
 0x78f   : > { %1173 = vadd.xlane.f32.xlu2 %v1172_v8 }
 0x79a   : > { %v1406_v14 = vpop.permute.xlu1 %1405 }
 0x7a5   : > { %v1231_v9 = vpop.xlane.xlu0 %1230 }
 0x7a6   : > { %v1232_v10 = vsub.f32 %v1228_v57, %v1231_v9 }
 0x7a7   : > { %1403 = vrot.lane.b32.xlu2 %v1094_v37, %s2307_s28 }
 0x7a8   : > { %v1233_v7 = vmul.f32 1.442695, %v1232_v10 }
 0x7aa   : > { %1817 = vpow2.f32 %v1233_v7 }
 0x7b0   : > { %v1818_v11 = vpop.eup %1817 }
 0x7b1   : > { %v1235_v13 = vsel %vm588_vm1, %v1818_v11, 0.0 }
 0x7b2   : > { %1236 = vadd.xlane.f32.xlu0 %v1235_v13 }
 0x7c5   : > { %v1344_v15 = vpop.xlane.xlu1 %1343 }
 0x7c6   : > { %v1345_v16 = vsub.f32 %v1341_v60, %v1344_v15  ;;  %v1522_v60 = vld [vmem:[%s2292_s11 + $0x8] sm:$0xff] }
 0x7c8   : > { %v1346_v17 = vmul.f32 1.442695, %v1345_v16 }
 0x7ca   : > { %1819 = vpow2.f32 %v1346_v17  ;;  %v1560_v17 = vld [vmem:[%s2294_s13 + $0x38] sm:$0xff] }
 0x7d0   : > { %v1820_v18 = vpop.eup %1819 }
 0x7d1   : > { %v1348_v19 = vsel %vm588_vm1, %v1820_v18, 0.0 }
 0x7d2   : > { %1349 = vadd.xlane.f32.xlu0 %v1348_v19  ;;  %v1558_v19 = vld [vmem:[%s2294_s13 + $0x28] sm:$0xff] }
 0x7e6   : > { %1241 = vrot.lane.b32.xlu0 %v2150_v52, %s1849_s22 }
 0x802   : > { %v1174_v20 = vpop.xlane.xlu2 %1173 }
 0x803   : > { %1821 = vrcp.f32 %v1174_v20  ;;  %v1557_v20 = vld [vmem:[%s2294_s13 + $0x20] sm:$0xff] }
 0x809   : > { %v1822_v21 = vpop.eup %1821 }
 0x80a   : > { %v1176_v0 = vmul.f32 %v1822_v21, %v1816_v6  ;;  %v1404_v27 = vpop.permute.xlu2 %1403  ;;  %v1556_v21 = vld [vmem:[%s2294_s13 + $0x18] sm:$0xff] }
 0x80c   : > { %1745 = vmatmul.msk.f32.vlgmr.msrb.gmra.mxu0 %vm588_vm1, %v1176_v0 }
 0x80d   : > { %1755 = vmatpush.xpose.msk.msrb.mxu0 %vm588_vm1, %v1406_v14 }
 0x810   : > { %949 = vadd.xlane.f32.xlu0 %v948_v1  ;;  %v1555_v1 = vld [vmem:[%s2294_s13 + $0x10] sm:$0xff] }
 0x825   : > { %v1237_v22 = vpop.xlane.xlu0 %1236 }
 0x826   : > { %1823 = vrcp.f32 %v1237_v22 }
 0x82c   : > { %v1824_v24 = vpop.eup %1823 }
 0x82d   : > { %v1239_v25 = vmul.f32 %v1824_v24, %v1818_v11  ;;  %v1553_v24 = vld [vmem:[%s2294_s13] sm:$0xff] }
 0x845   : > { %v1350_v23 = vpop.xlane.xlu0 %1349 }
 0x846   : > { %1825 = vrcp.f32 %v1350_v23  ;;  %v1554_v23 = vld [vmem:[%s2294_s13 + $0x8] sm:$0xff] }
 0x84c   : > { %v1826_v37 = vpop.eup %1825 }
 0x84d   : > { %v1352_v38 = vmul.f32 %v1826_v37, %v1820_v18 }
 0x858   : > { %v1242_v26 = vpop.permute.xlu0 %1241 }
 0x859   : > { %1262 = vmatpush.msrb.mxu1 %v1242_v26 }
 0x85a   : > { %1748 = vmatmul.msk.f32.vlgmr.msrb.gmra.mxu1 %vm588_vm1, %v1239_v25 }
 0x883   : > { %v950_v49 = vpop.xlane.xlu0 %949 }
 0x889   : > { %v1197_v3 = vpop.f32.mrf.mxu0 }
 0x88a   : > { %1750 = vmatmul.msk.f32.vlgmr.msra.gmra.mxu0 %vm588_vm1, %v1197_v3 }
 0x88b   : > { %1576 = vmatpush.msra.mxu0 %v1560_v17 }
 0x892   : > { %1756 = vmatmul.msk.f32.vlgmr.msrb.gmra.mxu0 %vm588_vm1, %v1404_v27  ;;  %v2236_v27 = vld [vmem:[%s2287_s6] sm:$0xff] }
 0x8d7   : > { %v1264_v28 = vpop.f32.mrf.mxu1 }
 0x8d8   : > { %1749 = vmatmul.msk.f32.vlgmr.msra.gmra.mxu3 %vm588_vm1, %v1264_v28 }
 0x907   : > { %v1310_v30 = vpop.f32.mrf.mxu0 }
 0x90f   : > { %v1428_v31 = vpop.f32.mrf.mxu0 }
 0x910   : > { %v1431_v4 = vmul.f32 0.35355338, %v1428_v31 }
 0x912   : > { %v1432_v32 = vsel %vm588_vm1, %v1431_v4, -inf }
 0x913   : > { %1433 = vmax.xlane.f32.xlu2 %v1432_v32 }
 0x92b   : > { %1353 = vrot.lane.b32.xlu2 %v2150_v52, %s2305_s23 }
 0x95b   : > { %v1287_v63 = vpop.f32.mrf.mxu3 }
 0x95c   : > { %v1311_v6 = vadd.f32 %v1310_v30, %v1287_v63  ;;  %v977_v30 = vperm.slane %v2236_v27, 0 }
 0x986   : > { %v1434_v34 = vpop.xlane.xlu2 %1433 }
 0x987   : > { %v1435_v35 = vsub.f32 %v1431_v4, %v1434_v34 }
 0x989   : > { %v1436_v36 = vmul.f32 1.442695, %v1435_v35  ;;  %v979_v35 = vperm.slane %v2236_v27, 1 }
 0x98b   : > { %1827 = vpow2.f32 %v1436_v36  ;;  %v1796_v36 = vld [vmem:[%s2291_s10] ss:$0 sm:$0xff] }
 0x98c   : > { %1829 = vrcp.f32 %v1860_v5  ;;  %v1797_v5 = vld [vmem:[%s2293_s12] ss:$0 sm:$0xff] }
 0x98e   : > { %v1354_v39 = vpop.permute.xlu2 %1353 }
 0x98f   : > { %1374 = vmatpush.msra.mxu1 %v1354_v39 }
 0x990   : > { %1753 = vmatmul.msk.f32.vlgmr.msra.gmra.mxu1 %vm588_vm1, %v1352_v38 }
 0x991   : > { %v1828_v40 = vpop.eup %1827  ;;  %1487 = vmatpush.msrb.mxu1 %v2063_v12 }
 0x992   : > { %v1438_v41 = vsel %vm588_vm1, %v1828_v40, 0.0  ;;  %v1830_v42 = vpop.eup %1829 }
 0x993   : > { %1439 = vadd.xlane.f32.xlu1 %v1438_v41  ;;  %v952_v43 = vmul.f32 32.0, %v1830_v42  ;;  %vm956_vm3 = vweird.f32 %v1830_v42 }
 0x995   : > { %v953_v45 = vsub.f32 1.0, %v952_v43 }
 0x997   : > { %v954_v46 = vmul.f32 %v1830_v42, %v953_v45 }
 0x999   : > { %v955_v47 = vadd.f32 %v1830_v42, %v954_v46 }
 0x99b   : > { %v2180_v48 = vsel %vm956_vm3, %v1830_v42, %v955_v47 }
 0x99c   : > { %v958_v50 = vmul.f32 %v2180_v48, %v950_v49 }
 0x99e   : > { %v2184_v12 = vsub.f32 %v2110_v29, %v958_v50  ;;  %v1524_v29 = vld [vmem:[%s2292_s11 + $0x18] sm:$0xff] }
 0x99f   : > { %1544 = vmatpush.msra.mxu3 %v1524_v29 }
 0x9a0   : > { %v960_v51 = vmul.f32 %v2184_v12, %v2184_v12 }
 0x9a1   : > { %1545 = vmatpush.msra.mxu3 %v1523_v59 }
 0x9a3   : > { %1546 = vmatpush.msra.mxu3 %v1522_v60  ;;  %v1517_v60 = vperm.slane %v2236_v27, 4 }
 0x9a5   : > { %1547 = vmatpush.msra.mxu3 %v1521_v61 }
 0x9ac   : > { %1443 = vrot.lane.b32.xlu1 %v2150_v52, %s2307_s28  ;;  %v961_v52 = vsel %vm561_vm0, %v960_v51, 0.0 }
 0x9d6   : > { %962 = vadd.xlane.f32.xlu1 %v961_v52 }
 0xa06   : > { %v1440_v54 = vpop.xlane.xlu1 %1439 }
 0xa07   : > { %1831 = vrcp.f32 %v1440_v54 }
 0xa0d   : > { %v1376_v53 = vpop.f32.mrf.mxu1  ;;  %v1832_v55 = vpop.eup %1831 }
 0xa0e   : > { %1754 = vmatmul.msk.f32.vlgmr.msrb.gmra.mxu3 %vm588_vm1, %v1376_v53  ;;  %v1442_v56 = vmul.f32 %v1832_v55, %v1828_v40  ;;  %v1047_v40 = vadd.f32 %v1796_v36, %v1046_v62  ;;  %v1798_v62 = vld [vmem:[%s2295_s14] ss:$0 sm:$0xff] }
 0xa1e   : > { %v1444_v57 = vpop.permute.xlu1 %1443 }
 0xa1f   : > { %1464 = vmatpush.msra.mxu2 %v1444_v57 }
 0xa20   : > { %1757 = vmatmul.msk.f32.vlgmr.msra.gmra.mxu2 %vm588_vm1, %v1442_v56 }
 0xa49   : > { %v963_v14 = vpop.xlane.xlu1 %962 }
 0xa4a   : > { %v964_v15 = vmul.f32 %v963_v14, %v2180_v48 }
 0xa4c   : > { %v965_v16 = vadd.f32 1e-05, %v964_v15 }
 0xa4e   : > { %1833 = vrsqrt.f32 %v965_v16  ;;  %vm972_vm5 = vweird.f32 %v965_v16 }
 0xa91   : > { %v1399_v33 = vpop.f32.mrf.mxu3 }
 0xa92   : > { %v1402_v8 = vadd.f32 %v1399_v33, %v1311_v6  ;;  %v1519_v33 = vperm.slane %v2236_v27, 5 }
 0xaa3   : > { %v1466_v58 = vpop.f32.mrf.mxu2 }
 0xaa4   : > { %1758 = vmatmul.msk.f32.vlgmr.msrb.gmra.mxu1 %vm588_vm1, %v1466_v58 }
 0xb21   : > { %v1489_v9 = vpop.f32.mrf.mxu1 }
 0xb22   : > { %v1492_v10 = vadd.f32 %v1489_v9, %v1402_v8 }
 0xb24   : > { %v1493_v7 = vadd.f32 %v2106_v2, %v1492_v10  ;;  %v1559_v2 = vld [vmem:[%s2294_s13 + $0x30] sm:$0xff] }
 0xb25   : > { %1577 = vmatpush.msra.mxu0 %v1559_v2 }
 0xb26   : > { %v1494_v11 = vadd.f32 %v1493_v7, %v2140_v44  ;;  %v1834_v44 = vpop.eup %1833 }
 0xb27   : > { %v967_v18 = vmul.f32 %v1834_v44, %v965_v16  ;;  %1578 = vmatpush.msra.mxu0 %v1558_v19  ;;  %vm973_vm4 = vweird.f32 %v1834_v44 }
 0xb28   : > { %1759 = vmatmul.msk.f32.vlgmr.msra.gmra.mxu3 %vm561_vm0, %v1494_v11  ;;  %v1495_v13 = vsel %vm561_vm0, %v1494_v11, 0.0  ;;  %vm974_vm6 = vmor %vm972_vm5, %vm973_vm4 }
 0xb29   : > { %1496 = vadd.xlane.f32.xlu2 %v1495_v13  ;;  %1579 = vmatpush.msra.mxu0 %v1557_v20  ;;  %v968_v0 = vmul.f32 %v1834_v44, %v967_v18 }
 0xb2b   : > { %1580 = vmatpush.msra.mxu0 %v1556_v21  ;;  %v969_v22 = vmul.f32 0.5, %v968_v0 }
 0xb2d   : > { %1581 = vmatpush.msra.mxu0 %v1555_v1  ;;  %v970_v25 = vsub.f32 1.5, %v969_v22  ;;  %v1072_v1 = vperm.slane %v2236_v27, 2 }
 0xb2f   : > { %1582 = vmatpush.msra.mxu0 %v1554_v23  ;;  %v971_v26 = vmul.f32 %v1834_v44, %v970_v25 }
 0xb31   : > { %1583 = vmatpush.msra.mxu0 %v1553_v24  ;;  %v975_v3 = vsel %vm974_vm6, %v1834_v44, %v971_v26  ;;  %v1074_v24 = vperm.slane %v2236_v27, 3 }
 0xb32   : > { %v976_v28 = vmul.f32 %v975_v3, %v2184_v12 }
 0xb34   : > { %v978_v34 = vmul.f32 %v977_v30, %v976_v28 }
 0xb36   : > { %v980_v39 = vadd.f32 %v979_v35, %v978_v34 }
 0xb38   : > { %v1049_v41 = vadd.f32 %v1047_v40, %v980_v39  ;;  %v1611_v39 = vperm.slane %v2236_v27, 6 }
 0xb3a   : > { %v1050_v43 = vsel %vm561_vm0, %v1049_v41, 0.0 }
 0xb9c   : > { %v1497_v31 = vpop.xlane.xlu2 %1496 }
 0xb9d   : > { %v1498_v4 = vmul.f32 %v1497_v31, %v2180_v48 }
 0xb9f   : > { %v1499_v32 = vsub.f32 %v1494_v11, %v1498_v4 }
 0xba1   : > { %v1500_v37 = vmul.f32 %v1499_v32, %v1499_v32 }
 0xba3   : > { %v1501_v38 = vsel %vm561_vm0, %v1500_v37, 0.0 }
 0xba4   : > { %1502 = vadd.xlane.f32.xlu0 %v1501_v38 }
 0xbab   : > { %v1549_v42 = vpop.f32.mrf.mxu3 }
 0xbac   : > { %v1550_v45 = vadd.f32 %v1797_v5, %v1549_v42  ;;  %1051 = vadd.xlane.f32.xlu0 %v1050_v43 }
 0xbae   : > { %v1552_v46 = vmax.f32 %v1550_v45, 0.0 }
 0xbb0   : > { %1760 = vmatmul.msk.f32.vlgmr.msra.gmra.mxu0 %vm1025_vm2, %v1552_v46 }
 0xc17   : > { %v1503_v47 = vpop.xlane.xlu0 %1502 }
 0xc18   : > { %v1504_v49 = vmul.f32 %v1503_v47, %v2180_v48 }
 0xc1a   : > { %v1505_v50 = vadd.f32 1e-05, %v1504_v49 }
 0xc1c   : > { %1835 = vrsqrt.f32 %v1505_v50  ;;  %vm1512_vm8 = vweird.f32 %v1505_v50 }
 0xc1f   : > { %v1052_v12 = vpop.xlane.xlu0 %1051 }
 0xc20   : > { %v1053_v51 = vmul.f32 %v1052_v12, %v2180_v48 }
 0xc22   : > { %v1836_v52 = vpop.eup %1835  ;;  %v1054_v53 = vsub.f32 %v1049_v41, %v1053_v51  ;;  %v1613_v41 = vperm.slane %v2236_v27, 7 }
 0xc23   : > { %v1507_v54 = vmul.f32 %v1836_v52, %v1505_v50  ;;  %vm1513_vm7 = vweird.f32 %v1836_v52 }
 0xc24   : > { %v1055_v55 = vmul.f32 %v1054_v53, %v1054_v53  ;;  %vm1514_vm9 = vmor %vm1512_vm8, %vm1513_vm7 }
 0xc25   : > { %v1508_v56 = vmul.f32 %v1836_v52, %v1507_v54 }
 0xc26   : > { %v1056_v57 = vsel %vm561_vm0, %v1055_v55, 0.0 }
 0xc27   : > { %v1509_v58 = vmul.f32 0.5, %v1508_v56  ;;  %1057 = vadd.xlane.f32.xlu0 %v1056_v57 }
 0xc29   : > { %v1510_v29 = vsub.f32 1.5, %v1509_v58 }
 0xc2b   : > { %v1511_v59 = vmul.f32 %v1836_v52, %v1510_v29 }
 0xc2d   : > { %v1515_v61 = vsel %vm1514_vm9, %v1836_v52, %v1511_v59  ;;  %v1585_v6 = vpop.f32.mrf.mxu0 }
 0xc2e   : > { %v1516_v63 = vmul.f32 %v1515_v61, %v1499_v32  ;;  %v1586_v9 = vadd.f32 %v1798_v62, %v1585_v6 }
 0xc30   : > { %v1518_v8 = vmul.f32 %v1517_v60, %v1516_v63 }
 0xc32   : > { %v1520_v10 = vadd.f32 %v1519_v33, %v1518_v8 }
 0xc34   : > { %v1588_v7 = vadd.f32 %v1586_v9, %v1520_v10 }
 0xc36   : > { %v1589_v11 = vsel %vm561_vm0, %v1588_v7, 0.0 }
 0xc37   : > { %1590 = vadd.xlane.f32.xlu2 %v1589_v11 }
 0xc9a   : > { %v1058_v13 = vpop.xlane.xlu0 %1057 }
 0xc9b   : > { %v1059_v14 = vmul.f32 %v1058_v13, %v2180_v48 }
 0xc9d   : > { %v1060_v15 = vadd.f32 1e-05, %v1059_v14 }
 0xc9f   : > { %1837 = vrsqrt.f32 %v1060_v15  ;;  %vm1067_vm11 = vweird.f32 %v1060_v15 }
 0xca5   : > { %v1838_v16 = vpop.eup %1837 }
 0xca6   : > { %v1062_v17 = vmul.f32 %v1838_v16, %v1060_v15  ;;  %vm1068_vm10 = vweird.f32 %v1838_v16 }
 0xca7   : > { %vm1069_vm12 = vmor %vm1067_vm11, %vm1068_vm10 }
 0xca8   : > { %v1063_v2 = vmul.f32 %v1838_v16, %v1062_v17 }
 0xcaa   : > { %v1064_v44 = vmul.f32 0.5, %v1063_v2  ;;  %v1591_v18 = vpop.xlane.xlu2 %1590 }
 0xcab   : > { %v1592_v19 = vmul.f32 %v1591_v18, %v2180_v48 }
 0xcac   : > { %v1065_v20 = vsub.f32 1.5, %v1064_v44 }
 0xcad   : > { %v1593_v21 = vsub.f32 %v1588_v7, %v1592_v19 }
 0xcae   : > { %v1066_v0 = vmul.f32 %v1838_v16, %v1065_v20 }
 0xcaf   : > { %v1594_v22 = vmul.f32 %v1593_v21, %v1593_v21 }
 0xcb0   : > { %v1070_v23 = vsel %vm1069_vm12, %v1838_v16, %v1066_v0 }
 0xcb1   : > { %v1071_v25 = vmul.f32 %v1070_v23, %v1054_v53  ;;  %v1595_v26 = vsel %vm561_vm0, %v1594_v22, 0.0 }
 0xcb2   : > { %1596 = vadd.xlane.f32.xlu2 %v1595_v26 }
 0xcb3   : > { %v1073_v3 = vmul.f32 %v1072_v1, %v1071_v25 }
 0xcb5   : > { %v1075_v28 = vadd.f32 %v1074_v24, %v1073_v3 }
 0xcb7   : > { %1615 = vst.msk [vmem:[%s540_s25] sm:$0xff] %vm561_vm0, %v1075_v28 }
 0xd25   : > { %v1597_v30 = vpop.xlane.xlu2 %1596 }
 0xd26   : > { %v1598_v31 = vmul.f32 %v1597_v30, %v2180_v48 }
 0xd28   : > { %v1599_v4 = vadd.f32 1e-05, %v1598_v31 }
 0xd2a   : > { %1839 = vrsqrt.f32 %v1599_v4  ;;  %vm1606_vm14 = vweird.f32 %v1599_v4 }
 0xd30   : > { %v1840_v32 = vpop.eup %1839 }
 0xd31   : > { %v1601_v34 = vmul.f32 %v1840_v32, %v1599_v4  ;;  %vm1607_vm13 = vweird.f32 %v1840_v32 }
 0xd32   : > { %vm1608_vm15 = vmor %vm1606_vm14, %vm1607_vm13 }
 0xd33   : > { %v1602_v35 = vmul.f32 %v1840_v32, %v1601_v34 }
 0xd35   : > { %v1603_v36 = vmul.f32 0.5, %v1602_v35 }
 0xd37   : > { %v1604_v37 = vsub.f32 1.5, %v1603_v36 }
 0xd39   : > { %v1605_v38 = vmul.f32 %v1840_v32, %v1604_v37 }
 0xd3b   : > { %v1609_v40 = vsel %vm1608_vm15, %v1840_v32, %v1605_v38 }
 0xd3c   : > { %v1610_v5 = vmul.f32 %v1609_v40, %v1593_v21 }
 0xd3e   : > { %v1612_v42 = vmul.f32 %v1611_v39, %v1610_v5 }
 0xd40   : > { %v1614_v48 = vadd.f32 %v1613_v41, %v1612_v42 }
 0xd42   : > { %1616 = vst.msk [vmem:[%s544_s29] sm:$0xff] %vm561_vm0, %v1614_v48 }
 0xd43 PF: > { %s27_s21 = sadd.s32 1, %s1847_s21  }
 0xd44   : > { %p24_p4 = scmp.ge.s32.totalorder %s27_s21, 4  }
 0xd46   :  { %26 = sbr.rel (!%p24_p4) target bundleno = 2 (0x2), region = 125 }

</bundles_post_ra>
